<compile_context>
chip_gen: v5e
topology: v5e:2x2
jax: 0.10.0
libtpu: 0.0.40
codegen_flags: <defaults>
</compile_context>

<pallas_src>
import jax
import jax.numpy as jnp
from jax.experimental import pallas as pl
from jax.experimental.pallas import tpu as pltpu

DIM = 300    # embedding_size = dim = 300 in the reference module
K = 24       # k = 24 projection matrices
NBLK = 4     # grid steps over K ("parallel" axis -> 2 steps per TC on v7x)
KB = K // NBLK
assert K % NBLK == 0


def hhd_kernel(q_ref,       # (B, DIM)        query embeddings, matmul dtype (f32/bf16)
               c_ref,       # (B, M, DIM)     f32: [cand | negs] stacked, M = N + 1
               p_ref,       # (KB, DIM, DIM)  pre-transposed proj block p[jj][e, d]
               w_ref,       # (1, KB)         f32: W slice for this K-block
               out_ref,     # (B, M)          f32 partial output for this K-block
               proj_ref):   # VMEM scratch (B, KB, DIM) f32
    q = q_ref[...]                                        # (B, DIM) matmul dtype

    # KB projection matmuls on the MXU; f32 results parked in VMEM scratch.
    # proj[b, jj, d] = sum_e proj_mats[j, d, e] * q[b, e]   (proj pre-transposed)
    for jj in range(KB):                                  # static unroll (KB = 6)
        pj = jnp.dot(q, p_ref[jj], preferred_element_type=jnp.float32)   # (B, DIM) f32
        proj_ref[:, jj:jj + 1, :] = pj[:, None, :]

    proj = proj_ref[...]                                  # (B, KB, DIM) f32
    c = c_ref[...]                                        # (B, M, DIM)  f32

    # MXU batched contraction over DIM (replaces 2*KB VPU broadcast+XLU reduces):
    #   s[b, m, jj] = <C[b, m], proj[b, jj]>
    s = jnp.einsum('bmd,bjd->bmj', c, proj,
                   preferred_element_type=jnp.float32)    # (B, M, KB) f32

    # Apply this K-block's slice of the output Linear weights in one shot.
    w = w_ref[...]                                        # (1, KB) f32
    out_ref[...] = jnp.sum(s * w[None, :, :], axis=-1)    # (B, M) partial; bias in wrapper


def hhd_forward(query_idx, cand_idx, neg_idx, embedding, proj_mats, out_w, out_b,
                *, proj_dtype=jnp.bfloat16):
    """Pallas implementation of HHD.forward. Returns (simPosOutput, simNegsOutput).

    proj_dtype: dtype of the streamed projection matrices / query matmul operand
    (default bf16: halves the dominant HBM traffic; accumulation stays f32).
    """
    B = query_idx.shape[0]
    N = neg_idx.shape[1]
    M = N + 1

    # Glue (embedding lookup + parameter packing) in plain JAX.
    q = jnp.take(embedding, query_idx, axis=0).astype(jnp.float32)       # (B, DIM)
    cand = jnp.take(embedding, cand_idx, axis=0).astype(jnp.float32)     # (B, DIM)
    neg = jnp.take(embedding, neg_idx, axis=0).astype(jnp.float32)       # (B, N, DIM)

    # Stack cand + negs so the kernel does ONE batched MXU contraction per step.
    c_all = jnp.concatenate([cand[:, None, :], neg], axis=1)             # (B, M, DIM) f32

    # Cast the matmul LHS once here (not per grid step inside the kernel).
    q_mx = q.astype(proj_dtype)                                          # (B, DIM)

    # One-time transpose so the in-kernel dot contracts the RHS leading axis;
    # bf16 (default) halves the 8.6 MB proj stream.
    p_t = jnp.swapaxes(proj_mats, 1, 2).astype(proj_dtype)               # (K, DIM, DIM)

    # Output Linear weights, arranged per K-block: w_blocks[i, 0, jj] = W[0, i*KB+jj].
    w_blocks = out_w.reshape(K).astype(jnp.float32).reshape(NBLK, 1, KB)

    grid_spec = pltpu.PrefetchScalarGridSpec(
        num_scalar_prefetch=0,
        grid=(NBLK,),
        in_specs=[
            pl.BlockSpec((B, DIM), lambda i: (0, 0)),                    # q (matmul dtype)
            pl.BlockSpec((B, M, DIM), lambda i: (0, 0, 0)),              # [cand | negs] f32
            pl.BlockSpec((KB, DIM, DIM), lambda i: (i, 0, 0)),           # proj K-block
            pl.BlockSpec((None, 1, KB), lambda i: (i, 0, 0)),            # W K-block
        ],
        out_specs=pl.BlockSpec((None, B, M), lambda i: (i, 0, 0)),       # packed partials
        scratch_shapes=[pltpu.VMEM((B, KB, DIM), jnp.float32)],          # per-step proj
    )

    parts = pl.pallas_call(
        hhd_kernel,
        out_shape=jax.ShapeDtypeStruct((NBLK, B, M), jnp.float32),
        grid_spec=grid_spec,
        compiler_params=pltpu.CompilerParams(
            dimension_semantics=("parallel",),          # no cross-step carry -> legal
            vmem_limit_bytes=32 * 1024 * 1024),         # headroom for the f32-proj path
    )(q_mx, c_all, p_t, w_blocks)

    bias = out_b.reshape(()).astype(jnp.float32)
    fused = jnp.sum(parts, axis=0) + bias               # (B, M); exact f32 partial sum
    pos_out = fused[:, 0:1]                             # (B, 1)  == simPosOutput
    neg_out = fused[:, 1:]                              # (B, N)  == simNegsOutput
    return pos_out, neg_out


def hhd_reference(query_idx, cand_idx, neg_idx, embedding, proj_mats, out_w, out_b):
    """Pure-JAX reference mirroring the PyTorch forward exactly."""
    q = embedding[query_idx]                                     # (B, DIM)
    cand = embedding[cand_idx]                                   # (B, DIM)
    neg = embedding[neg_idx]                                     # (B, N, DIM)
    batch_proj = jnp.einsum('kde,be->bkd', proj_mats, q)         # (B, K, DIM)
    sim_pos = jnp.einsum('bkd,bd->bk', batch_proj, cand)         # (B, K)
    pos_out = sim_pos @ out_w.T + out_b                          # (B, 1)
    sim_negs = jnp.einsum('bnd,bkd->bnk', neg, batch_proj)       # (B, N, K)
    neg_out = (sim_negs @ out_w.T + out_b)[..., 0]               # (B, N)
    return pos_out, neg_out


if __name__ == "__main__":
    B = 2          # batch
    N = 4          # number of negative hypernyms per example
    VOCAB = 64     # small synthetic vocabulary

    key = jax.random.PRNGKey(0)
    k_emb, k_proj, k_w, k_b, k_q, k_c, k_n = jax.random.split(key, 7)

    # Deterministic synthetic parameters (module's __init__ shapes).
    embedding = jax.random.normal(k_emb, (VOCAB, DIM), jnp.float32)
    var = 2.0 / (DIM + DIM)
    proj_mats = (jax.random.normal(k_proj, (K, DIM, DIM), jnp.float32) * var
                 + jnp.eye(DIM, dtype=jnp.float32)[None, :, :])
    out_w = jax.random.normal(k_w, (1, K), jnp.float32) * (1.0 / jnp.sqrt(K))
    out_b = jax.random.normal(k_b, (1,), jnp.float32) * 0.01

    query_idx = jax.random.randint(k_q, (B,), 0, VOCAB, dtype=jnp.int32)
    cand_idx = jax.random.randint(k_c, (B,), 0, VOCAB, dtype=jnp.int32)
    neg_idx = jax.random.randint(k_n, (B, N), 0, VOCAB, dtype=jnp.int32)

    ref_pos, ref_neg = hhd_reference(query_idx, cand_idx, neg_idx,
                                     embedding, proj_mats, out_w, out_b)

    # f32 proj path (tighter validation; MXU contractions in play).
    pos_f32, neg_f32 = hhd_forward(query_idx, cand_idx, neg_idx,
                                   embedding, proj_mats, out_w, out_b,
                                   proj_dtype=jnp.float32)
    jax.block_until_ready((pos_f32, neg_f32))
    assert pos_f32.shape == (B, 1) and neg_f32.shape == (B, N)
    assert jnp.allclose(pos_f32, ref_pos, rtol=1e-2, atol=1e-2)
    assert jnp.allclose(neg_f32, ref_neg, rtol=1e-2, atol=1e-2)

    # Default (bf16 proj) path: halves proj HBM traffic; f32 accumulation.
    # Documented tolerance: rtol=5e-2 / atol=5e-1 (bf16 operand rounding).
    pos_bf, neg_bf = hhd_forward(query_idx, cand_idx, neg_idx,
                                 embedding, proj_mats, out_w, out_b)
    jax.block_until_ready((pos_bf, neg_bf))
    assert pos_bf.shape == (B, 1) and neg_bf.shape == (B, N)
    assert jnp.allclose(pos_bf, ref_pos, rtol=5e-2, atol=5e-1)
    assert jnp.allclose(neg_bf, ref_neg, rtol=5e-2, atol=5e-1)

    print("KERNEL_OK")
</pallas_src>

<mosaic_0001>
module attributes {stable_mosaic.version = 11 : i64} {
  func.func @hhd_kernel(%arg0: i32, %arg1: memref<2x300xf32, #tpu.memory_space<vmem>>, %arg2: memref<2x5x300xf32, #tpu.memory_space<vmem>>, %arg3: memref<6x300x300xf32, #tpu.memory_space<vmem>>, %arg4: memref<1x1x6xf32, #tpu.memory_space<vmem>>, %arg5: memref<1x2x5xf32, #tpu.memory_space<vmem>>, %arg6: memref<2x6x300xf32, #tpu.memory_space<vmem>>) attributes {dimension_semantics = [#tpu.dimension_semantics<parallel>], iteration_bounds = array<i64: 4>, scalar_prefetch = 0 : i64, scratch_operands = 1 : i64, tpu.core_type = #tpu.core_type<tc>, window_params = [{pipeline_mode = #tpu.pipeline_mode<synchronous>, transform_indices = @transform_0, window_bounds = array<i64: 2, 300>}, {pipeline_mode = #tpu.pipeline_mode<synchronous>, transform_indices = @transform_1, window_bounds = array<i64: 2, 5, 300>}, {transform_indices = @transform_2, window_bounds = array<i64: 6, 300, 300>}, {transform_indices = @transform_3, window_bounds = array<i64: 1, 1, 6>}, {transform_indices = @transform_4, window_bounds = array<i64: 1, 2, 5>}]} {
    %c0 = arith.constant 0 : index
    %c0_0 = arith.constant 0 : index
    %0 = vector.load %arg1[%c0, %c0_0] : memref<2x300xf32, #tpu.memory_space<vmem>>, vector<2x300xf32>
    %c0_1 = arith.constant 0 : index
    %c0_2 = arith.constant 0 : index
    %c0_3 = arith.constant 0 : index
    %1 = vector.load %arg3[%c0_1, %c0_2, %c0_3] : memref<6x300x300xf32, #tpu.memory_space<vmem>>, vector<1x300x300xf32>
    %2 = vector.shape_cast %1 : vector<1x300x300xf32> to vector<300x300xf32>
    %cst = arith.constant dense<0.000000e+00> : vector<2x300xf32>
    %3 = tpu.matmul %0, %2, %cst {dimension_numbers = #tpu.dot_dimension_numbers<[1], [0], [0], [1], [0, 0, 1, 1], [], []>} : vector<2x300xf32>, vector<300x300xf32>, vector<2x300xf32> -> vector<2x300xf32>
    %4 = vector.shape_cast %3 : vector<2x300xf32> to vector<2x1x300xf32>
    %c0_4 = arith.constant 0 : index
    %c0_5 = arith.constant 0 : index
    %c0_6 = arith.constant 0 : index
    %5 = vector.load %arg6[%c0_4, %c0_5, %c0_6] : memref<2x6x300xf32, #tpu.memory_space<vmem>>, vector<2x1x300xf32>
    tpu.vector_store %arg6[%c0_4, %c0_5, %c0_6], %4 {strides = array<i32>} : memref<2x6x300xf32, #tpu.memory_space<vmem>>, vector<2x1x300xf32>,
    %c1 = arith.constant 1 : index
    %c0_7 = arith.constant 0 : index
    %c0_8 = arith.constant 0 : index
    %6 = vector.load %arg3[%c1, %c0_7, %c0_8] : memref<6x300x300xf32, #tpu.memory_space<vmem>>, vector<1x300x300xf32>
    %7 = vector.shape_cast %6 : vector<1x300x300xf32> to vector<300x300xf32>
    %cst_9 = arith.constant dense<0.000000e+00> : vector<2x300xf32>
    %8 = tpu.matmul %0, %7, %cst_9 {dimension_numbers = #tpu.dot_dimension_numbers<[1], [0], [0], [1], [0, 0, 1, 1], [], []>} : vector<2x300xf32>, vector<300x300xf32>, vector<2x300xf32> -> vector<2x300xf32>
    %9 = vector.shape_cast %8 : vector<2x300xf32> to vector<2x1x300xf32>
    %c0_10 = arith.constant 0 : index
    %c1_11 = arith.constant 1 : index
    %c0_12 = arith.constant 0 : index
    %10 = vector.load %arg6[%c0_10, %c1_11, %c0_12] : memref<2x6x300xf32, #tpu.memory_space<vmem>>, vector<2x1x300xf32>
    tpu.vector_store %arg6[%c0_10, %c1_11, %c0_12], %9 {strides = array<i32>} : memref<2x6x300xf32, #tpu.memory_space<vmem>>, vector<2x1x300xf32>,
    %c2 = arith.constant 2 : index
    %c0_13 = arith.constant 0 : index
    %c0_14 = arith.constant 0 : index
    %11 = vector.load %arg3[%c2, %c0_13, %c0_14] : memref<6x300x300xf32, #tpu.memory_space<vmem>>, vector<1x300x300xf32>
    %12 = vector.shape_cast %11 : vector<1x300x300xf32> to vector<300x300xf32>
    %cst_15 = arith.constant dense<0.000000e+00> : vector<2x300xf32>
    %13 = tpu.matmul %0, %12, %cst_15 {dimension_numbers = #tpu.dot_dimension_numbers<[1], [0], [0], [1], [0, 0, 1, 1], [], []>} : vector<2x300xf32>, vector<300x300xf32>, vector<2x300xf32> -> vector<2x300xf32>
    %14 = vector.shape_cast %13 : vector<2x300xf32> to vector<2x1x300xf32>
    %c0_16 = arith.constant 0 : index
    %c2_17 = arith.constant 2 : index
    %c0_18 = arith.constant 0 : index
    %15 = vector.load %arg6[%c0_16, %c2_17, %c0_18] : memref<2x6x300xf32, #tpu.memory_space<vmem>>, vector<2x1x300xf32>
    tpu.vector_store %arg6[%c0_16, %c2_17, %c0_18], %14 {strides = array<i32>} : memref<2x6x300xf32, #tpu.memory_space<vmem>>, vector<2x1x300xf32>,
    %c3 = arith.constant 3 : index
    %c0_19 = arith.constant 0 : index
    %c0_20 = arith.constant 0 : index
    %16 = vector.load %arg3[%c3, %c0_19, %c0_20] : memref<6x300x300xf32, #tpu.memory_space<vmem>>, vector<1x300x300xf32>
    %17 = vector.shape_cast %16 : vector<1x300x300xf32> to vector<300x300xf32>
    %cst_21 = arith.constant dense<0.000000e+00> : vector<2x300xf32>
    %18 = tpu.matmul %0, %17, %cst_21 {dimension_numbers = #tpu.dot_dimension_numbers<[1], [0], [0], [1], [0, 0, 1, 1], [], []>} : vector<2x300xf32>, vector<300x300xf32>, vector<2x300xf32> -> vector<2x300xf32>
    %19 = vector.shape_cast %18 : vector<2x300xf32> to vector<2x1x300xf32>
    %c0_22 = arith.constant 0 : index
    %c3_23 = arith.constant 3 : index
    %c0_24 = arith.constant 0 : index
    %20 = vector.load %arg6[%c0_22, %c3_23, %c0_24] : memref<2x6x300xf32, #tpu.memory_space<vmem>>, vector<2x1x300xf32>
    tpu.vector_store %arg6[%c0_22, %c3_23, %c0_24], %19 {strides = array<i32>} : memref<2x6x300xf32, #tpu.memory_space<vmem>>, vector<2x1x300xf32>,
    %c4 = arith.constant 4 : index
    %c0_25 = arith.constant 0 : index
    %c0_26 = arith.constant 0 : index
    %21 = vector.load %arg3[%c4, %c0_25, %c0_26] : memref<6x300x300xf32, #tpu.memory_space<vmem>>, vector<1x300x300xf32>
    %22 = vector.shape_cast %21 : vector<1x300x300xf32> to vector<300x300xf32>
    %cst_27 = arith.constant dense<0.000000e+00> : vector<2x300xf32>
    %23 = tpu.matmul %0, %22, %cst_27 {dimension_numbers = #tpu.dot_dimension_numbers<[1], [0], [0], [1], [0, 0, 1, 1], [], []>} : vector<2x300xf32>, vector<300x300xf32>, vector<2x300xf32> -> vector<2x300xf32>
    %24 = vector.shape_cast %23 : vector<2x300xf32> to vector<2x1x300xf32>
    %c0_28 = arith.constant 0 : index
    %c4_29 = arith.constant 4 : index
    %c0_30 = arith.constant 0 : index
    %25 = vector.load %arg6[%c0_28, %c4_29, %c0_30] : memref<2x6x300xf32, #tpu.memory_space<vmem>>, vector<2x1x300xf32>
    tpu.vector_store %arg6[%c0_28, %c4_29, %c0_30], %24 {strides = array<i32>} : memref<2x6x300xf32, #tpu.memory_space<vmem>>, vector<2x1x300xf32>,
    %c5 = arith.constant 5 : index
    %c0_31 = arith.constant 0 : index
    %c0_32 = arith.constant 0 : index
    %26 = vector.load %arg3[%c5, %c0_31, %c0_32] : memref<6x300x300xf32, #tpu.memory_space<vmem>>, vector<1x300x300xf32>
    %27 = vector.shape_cast %26 : vector<1x300x300xf32> to vector<300x300xf32>
    %cst_33 = arith.constant dense<0.000000e+00> : vector<2x300xf32>
    %28 = tpu.matmul %0, %27, %cst_33 {dimension_numbers = #tpu.dot_dimension_numbers<[1], [0], [0], [1], [0, 0, 1, 1], [], []>} : vector<2x300xf32>, vector<300x300xf32>, vector<2x300xf32> -> vector<2x300xf32>
    %29 = vector.shape_cast %28 : vector<2x300xf32> to vector<2x1x300xf32>
    %c0_34 = arith.constant 0 : index
    %c5_35 = arith.constant 5 : index
    %c0_36 = arith.constant 0 : index
    %30 = vector.load %arg6[%c0_34, %c5_35, %c0_36] : memref<2x6x300xf32, #tpu.memory_space<vmem>>, vector<2x1x300xf32>
    tpu.vector_store %arg6[%c0_34, %c5_35, %c0_36], %29 {strides = array<i32>} : memref<2x6x300xf32, #tpu.memory_space<vmem>>, vector<2x1x300xf32>,
    %c0_37 = arith.constant 0 : index
    %c0_38 = arith.constant 0 : index
    %c0_39 = arith.constant 0 : index
    %31 = vector.load %arg6[%c0_37, %c0_38, %c0_39] : memref<2x6x300xf32, #tpu.memory_space<vmem>>, vector<2x6x300xf32>
    %c0_40 = arith.constant 0 : index
    %c0_41 = arith.constant 0 : index
    %c0_42 = arith.constant 0 : index
    %32 = vector.load %arg2[%c0_40, %c0_41, %c0_42] : memref<2x5x300xf32, #tpu.memory_space<vmem>>, vector<2x5x300xf32>
    "tpu.trace_start"() <{level = 10 : i32, message = "bmd,bjd->bmj"}> : () -> ()
    %cst_43 = arith.constant dense<0.000000e+00> : vector<2x5x6xf32>
    %33 = tpu.matmul %32, %31, %cst_43 {dimension_numbers = #tpu.dot_dimension_numbers<[2], [2], [1], [1], [0, 0, 0, 1, 1, 1], [0], [0]>} : vector<2x5x300xf32>, vector<2x6x300xf32>, vector<2x5x6xf32> -> vector<2x5x6xf32>
    "tpu.trace_stop"() : () -> ()
    %c0_44 = arith.constant 0 : index
    %c0_45 = arith.constant 0 : index
    %c0_46 = arith.constant 0 : index
    %34 = vector.load %arg4[%c0_44, %c0_45, %c0_46] : memref<1x1x6xf32, #tpu.memory_space<vmem>>, vector<1x1x6xf32>
    %35 = vector.shape_cast %34 : vector<1x1x6xf32> to vector<1x6xf32>
    %36 = vector.shape_cast %35 : vector<1x6xf32> to vector<1x1x6xf32>
    %37 = vector.broadcast %36 : vector<1x1x6xf32> to vector<2x5x6xf32>
    %38 = arith.mulf %33, %37 : vector<2x5x6xf32>
    %cst_47 = arith.constant dense<0.000000e+00> : vector<2x5xf32>
    %39 = vector.multi_reduction <add>, %38, %cst_47 [2] : vector<2x5x6xf32> to vector<2x5xf32>
    %c0_48 = arith.constant 0 : index
    %c0_49 = arith.constant 0 : index
    %c0_50 = arith.constant 0 : index
    %40 = vector.load %arg5[%c0_48, %c0_49, %c0_50] : memref<1x2x5xf32, #tpu.memory_space<vmem>>, vector<1x2x5xf32>
    %41 = vector.shape_cast %40 : vector<1x2x5xf32> to vector<2x5xf32>
    %42 = vector.shape_cast %39 : vector<2x5xf32> to vector<1x2x5xf32>
    tpu.vector_store %arg5[%c0_48, %c0_49, %c0_50], %42 {strides = array<i32>} : memref<1x2x5xf32, #tpu.memory_space<vmem>>, vector<1x2x5xf32>,
    return
  }
  func.func @transform_0(%arg0: i32) -> (i32, i32) {
    %c0_i32 = arith.constant 0 : i32
    %c0_i32_0 = arith.constant 0 : i32
    %c0_i32_1 = arith.constant 0 : i32
    return %c0_i32, %c0_i32_0 : i32, i32
  }
  func.func @transform_1(%arg0: i32) -> (i32, i32, i32) {
    %c0_i32 = arith.constant 0 : i32
    %c0_i32_0 = arith.constant 0 : i32
    %c0_i32_1 = arith.constant 0 : i32
    %c0_i32_2 = arith.constant 0 : i32
    return %c0_i32, %c0_i32_0, %c0_i32_1 : i32, i32, i32
  }
  func.func @transform_2(%arg0: i32) -> (i32, i32, i32) {
    %c0_i32 = arith.constant 0 : i32
    %c0_i32_0 = arith.constant 0 : i32
    %c0_i32_1 = arith.constant 0 : i32
    return %arg0, %c0_i32, %c0_i32_0 : i32, i32, i32
  }
  func.func @transform_3(%arg0: i32) -> (i32, i32, i32) {
    %c0_i32 = arith.constant 0 : i32
    %c0_i32_0 = arith.constant 0 : i32
    %c0_i32_1 = arith.constant 0 : i32
    return %arg0, %c0_i32, %c0_i32_0 : i32, i32, i32
  }
  func.func @transform_4(%arg0: i32) -> (i32, i32, i32) {
    %c0_i32 = arith.constant 0 : i32
    %c0_i32_0 = arith.constant 0 : i32
    %c0_i32_1 = arith.constant 0 : i32
    return %arg0, %c0_i32, %c0_i32_0 : i32, i32, i32
  }
}

</mosaic_0001>

<bundles_post_ra>
// kernel: tpu_custom_call.1
= control target key start
LH: loop header
LB: loop body
LE: loop exit
PB: predicated region body
PF: predicated region fallthrough
CT: control target
= control target key end

     0   :  { %9 = vsyncpa [#allocation4], 0  ;;  %s4213_s0 = inlined_call_operand.vmem [shape: f32[2,300], index: 0, kind: input, shape index: {}]   ;;  %s4214_s1 = inlined_call_operand.vmem [shape: f32[2,5,300], index: 1, kind: input, shape index: {}]   ;;  %s4215_s2 = inlined_call_operand.vmem [shape: f32[24,300,300], index: 2, kind: input, shape index: {}]   ;;  %s4216_s3 = inlined_call_operand.vmem [shape: f32[4,1,6], index: 3, kind: input, shape index: {}]   ;;  %s4217_s4 = inlined_call_operand.hbm [shape: f32[4,2,5], index: 4, kind: output, shape index: {}]  }
   0x1   :  { %11 = vsyncpa [#allocation4 + $0x1], 0  ;;  %s3206_s15 = smov 0   ;;  %s3208_s16 = smov 0  }
   0x2   :  { %s3210_s17 = smov 0   ;;  %s3212_s18 = smov 0  }
   0x3 LB: > { %s3227_s19 = sadd.s32 4294967295, %s3179_s18   ;;  %s2456_s20 = sadd.s32 4294967294, %s3179_s18   ;;  %s3179_s18 = sphi %s3212_s18, %s4225_s18   ;;  %s3175_s17 = sphi %s3210_s17, %s4224_s17   ;;  %s3171_s16 = sphi %s3208_s16, %s4223_s16   ;;  %s3167_s15 = sphi %s3206_s15, %s4222_s15  }
   0x4   : > { %s3231_s21 = sadd.s32 1, %s3179_s18   ;;  %s118_s22 = sadd.s32 1, %s3175_s17 }
   0x5   : > { %s115_s23 = ssub.s32 %s3179_s18, %s3231_s21  ;;  %p128_p0 = scmp.ne.s32.totalorder %s3175_s17, %s3171_s16 }
   0x6   : > { %p116_p1 = scmp.eq.s32.totalorder %s115_s23, 0  ;;  %p129_p2 = scmp.eq.s32.totalorder %s3227_s19, 3 }
   0x7   : > { %p134_p3 = scmp.ne.s32.totalorder %s3171_s16, %s3167_s15  ;;  %p135_p4 = scmp.eq.s32.totalorder %s2456_s20, 3 }
   0x8   : > { %s3242_s24 = scalar_select %p116_p1, %s3175_s17, %s118_s22  }
   0x9   : > { %p3244_p5 = por %p129_p2, %p128_p0  ;;  %p3248_p6 = por %p135_p4, %p134_p3 }
   0xa   : > { %p2459_p7 = scmp.ge.s32.totalorder %s3179_s18, 1  ;;  %p175_p8 = scmp.lt.s32.totalorder %s3179_s18, 5 }
   0xc   : > { %p176_p9 = pnand %p2459_p7, %p175_p8 }
   0xd   : > { %s205_s27 = smul.u32 (!%p176_p9), 6, %s3227_s19  ;;  %p212_p11 = scmp.lt.s32.totalorder (!%p176_p9), %s3227_s19, 3 }
   0xe   : > { %179 = sbr.rel (%p176_p9) target bundleno = 812 (0x32c), region = 36  ;;  %s3073_s9 = sshll.u32 (!%p176_p9), %s3227_s19, 1 }
   0xf   : > { %p206_p10 = scmp.lt.s32.totalorder (!%p176_p9), %s205_s27, 23  ;;  %s2383_s12 = scalar_lea.hbm (!%p176_p9), %s4217_s4, %s3073_s9 }
  0x10   : > { %s2387_s20 = sshll.u32 (!%p176_p9), %s2383_s12, 4  ;;  %s3137_s29 = scalar_lea.hbm (!%p176_p9), %s4217_s4, 8  ;;  %s2388_s20 = int_to_ptr.hbm [resolvable:$true] %s2387_s20 }
  0x13   : > { %s4227_s27 = smov (!%p206_p10, %s205_s27), 23  ;;  %v3258_v0 = vld [vmem:[%s4213_s0] sm:$0x3f]  ;;  %vm340_vm0 = vcmask 1043456   ;;  %vm337_vm1 = vcmask 359424   ;;  %vm535_vm2 = vcmask 1040384  }
  0x14   : > { %s3076_s30 = smul.u32 912, %s4227_s27  ;;  %331 = vst [vmem:[#allocation1] ss:$4 sm:$0xff] %v3258_v0  ;;  %vm539_vm3 = vcmask 1041409   ;;  %vm537_vm4 = vcmask 1041408   ;;  %vm541_vm5 = vcmask 1042433  }
  0x15   : > { %s213_s22 = scalar_select %p212_p11, %s3227_s19, 3  ;;  %vm2355_vm7 = vcmask 45056   ;;  %vm2370_vm8 = vcmask 33792  }
  0x16   : > { %s3264_s7 = scalar_lea.vmem %s4215_s2, %s3076_s30 }
  0x17   : > { %v261_v1 = vld [vmem:[%s3264_s7 + $0x168] sm:$0xff]  ;;  %v327_v3 = vld [vmem:[%s3264_s7 + $0x378] sm:$0xf]  ;;  %v262_v4 = vld [vmem:[%s3264_s7 + $0x170] sm:$0xff]  ;;  %s214_s6 = scalar_lea.vmem %s4216_s3, %s213_s22  ;;  %s3131_s22 = sshra.s32 %s2388_s20, 4  ;;  %s3132_s22 = int_to_ptr.hbm [resolvable:$true] %s3131_s22 }
  0x18   : > { %v309_v2 = vld [vmem:[%s3264_s7 + $0x2e8] sm:$0xff]  ;;  %350 = vmatpush.msra.mxu0 %v261_v1  ;;  %v258_v5 = vld [vmem:[%s3264_s7 + $0x150] sm:$0xff]  ;;  %2462 = vmatpush.msk.msra.mxu2 %vm340_vm0, %v327_v3  ;;  %v324_v7 = vld [vmem:[%s3264_s7 + $0x360] sm:$0xff]  ;;  %s3133_s23 = scalar_lea.hbm %s3132_s22, 2  ;;  %p3138_p1 = scmp.lt.s32.totalorder %s3132_s22, %s4217_s4 }
  0x19   : > { %370 = vmatpush.msra.mxu1 %v309_v2  ;;  %v306_v6 = vld [vmem:[%s3264_s7 + $0x2d0] sm:$0xff]  ;;  %410 = vmatpush.msra.mxu3 %v262_v4  ;;  %v259_v8 = vld [vmem:[%s3264_s7 + $0x158] sm:$0xff]  ;;  %v321_v11 = vld [vmem:[%s3264_s7 + $0x348] sm:$0xff]  ;;  %p3134_p12 = scmp.ne.s32.totalorder %s3132_s22, %s3133_s23  ;;  %p3139_p2 = scmp.lt.s32.totalorder %s3137_s29, %s3133_s23 }
  0x1a   : > { %v255_v9 = vld [vmem:[%s3264_s7 + $0x138] sm:$0xff]  ;;  %351 = vmatpush.msra.mxu0 %v258_v5  ;;  %v256_v12 = vld [vmem:[%s3264_s7 + $0x140] sm:$0xff]  ;;  %401 = vmatpush.msra.mxu2 %v324_v7  ;;  %v318_v15 = vld [vmem:[%s3264_s7 + $0x330] sm:$0xff] }
  0x1b   : > { %371 = vmatpush.msra.mxu1 %v306_v6  ;;  %v303_v10 = vld [vmem:[%s3264_s7 + $0x2b8] sm:$0xff]  ;;  %411 = vmatpush.msra.mxu3 %v259_v8  ;;  %v252_v13 = vld [vmem:[%s3264_s7 + $0x120] sm:$0xff]  ;;  %v253_v16 = vld [vmem:[%s3264_s7 + $0x128] sm:$0xff]  ;;  %p3135_p13 = pnand %p3134_p12, %p3244_p5  ;;  %p3140_p3 = por %p3139_p2, %p3138_p1 }
  0x1c   : > { %v300_v14 = vld [vmem:[%s3264_s7 + $0x2a0] sm:$0xff]  ;;  %352 = vmatpush.msra.mxu0 %v255_v9  ;;  %402 = vmatpush.msra.mxu2 %v321_v11  ;;  %v249_v17 = vld [vmem:[%s3264_s7 + $0x108] sm:$0xff]  ;;  %v315_v19 = vld [vmem:[%s3264_s7 + $0x318] sm:$0xff] }
  0x1d   : > { %372 = vmatpush.msra.mxu1 %v303_v10  ;;  %412 = vmatpush.msra.mxu3 %v256_v12  ;;  %v297_v18 = vld [vmem:[%s3264_s7 + $0x288] sm:$0xff]  ;;  %v250_v20 = vld [vmem:[%s3264_s7 + $0x110] sm:$0xff]  ;;  %v312_v23 = vld [vmem:[%s3264_s7 + $0x300] sm:$0xff]  ;;  %p3136_p0 = pneg %p3135_p13 }
  0x1e   : > { %353 = vmatpush.msra.mxu0 %v252_v13  ;;  %403 = vmatpush.msra.mxu2 %v318_v15  ;;  %v246_v21 = vld [vmem:[%s3264_s7 + $0xf0] sm:$0xff]  ;;  %v247_v24 = vld [vmem:[%s3264_s7 + $0xf8] sm:$0xff]  ;;  %v244_v28 = vld [vmem:[%s3264_s7 + $0xe0] sm:$0xff] }
  0x1f   : > { %373 = vmatpush.msra.mxu1 %v300_v14  ;;  %413 = vmatpush.msra.mxu3 %v253_v16  ;;  %v294_v22 = vld [vmem:[%s3264_s7 + $0x270] sm:$0xff]  ;;  %v243_v26 = vld [vmem:[%s3264_s7 + $0xd8] sm:$0xff]  ;;  %v240_v30 = vld [vmem:[%s3264_s7 + $0xc0] sm:$0xff]  ;;  %p3141_p4 = pnand %p3140_p3, %p3136_p0 }
  0x20   : > { %354 = vmatpush.msra.mxu0 %v249_v17  ;;  %404 = vmatpush.msra.mxu2 %v315_v19  ;;  %v310_v25 = vld [vmem:[%s3264_s7 + $0x2f0] sm:$0xff]  ;;  %v291_v27 = vld [vmem:[%s3264_s7 + $0x258] sm:$0xff]  ;;  %v288_v31 = vld [vmem:[%s3264_s7 + $0x240] sm:$0xff] }
  0x21   : > { %374 = vmatpush.msra.mxu1 %v297_v18  ;;  %414 = vmatpush.msra.mxu3 %v250_v20  ;;  %v307_v29 = vld [vmem:[%s3264_s7 + $0x2d8] sm:$0xff]  ;;  %v241_v32 = vld [vmem:[%s3264_s7 + $0xc8] sm:$0xff]  ;;  %v304_v33 = vld [vmem:[%s3264_s7 + $0x2c0] sm:$0xff] }
  0x22   : > { %355 = vmatpush.msra.mxu0 %v246_v21  ;;  %405 = vmatpush.msra.mxu2 %v312_v23  ;;  %v237_v34 = vld [vmem:[%s3264_s7 + $0xa8] sm:$0xff]  ;;  %v238_v36 = vld [vmem:[%s3264_s7 + $0xb0] sm:$0xff]  ;;  %v235_v40 = vld [vmem:[%s3264_s7 + $0x98] sm:$0xff] }
  0x23   : > { %375 = vmatpush.msra.mxu1 %v294_v22  ;;  %415 = vmatpush.msra.mxu3 %v247_v24  ;;  %v285_v35 = vld [vmem:[%s3264_s7 + $0x228] sm:$0xff]  ;;  %v234_v38 = vld [vmem:[%s3264_s7 + $0x90] sm:$0xff]  ;;  %v231_v42 = vld [vmem:[%s3264_s7 + $0x78] sm:$0xff] }
  0x24   : > { %430 = vmatpush.msrb.mxu2 %v310_v25  ;;  %356 = vmatpush.msra.mxu0 %v243_v26  ;;  %v301_v37 = vld [vmem:[%s3264_s7 + $0x2a8] sm:$0xff]  ;;  %v282_v39 = vld [vmem:[%s3264_s7 + $0x210] sm:$0xff]  ;;  %v279_v43 = vld [vmem:[%s3264_s7 + $0x1f8] sm:$0xff] }
  0x25   : > { %376 = vmatpush.msra.mxu1 %v291_v27  ;;  %416 = vmatpush.msra.mxu3 %v244_v28  ;;  %v298_v41 = vld [vmem:[%s3264_s7 + $0x290] sm:$0xff]  ;;  %v232_v44 = vld [vmem:[%s3264_s7 + $0x80] sm:$0xff]  ;;  %v295_v45 = vld [vmem:[%s3264_s7 + $0x278] sm:$0xff] }
  0x26   : > { %431 = vmatpush.msrb.mxu2 %v307_v29  ;;  %357 = vmatpush.msra.mxu0 %v240_v30  ;;  %v228_v46 = vld [vmem:[%s3264_s7 + $0x60] sm:$0xff]  ;;  %v229_v48 = vld [vmem:[%s3264_s7 + $0x68] sm:$0xff]  ;;  %v226_v52 = vld [vmem:[%s3264_s7 + $0x50] sm:$0xff] }
  0x27   : > { %377 = vmatpush.msra.mxu1 %v288_v31  ;;  %417 = vmatpush.msra.mxu3 %v241_v32  ;;  %v276_v47 = vld [vmem:[%s3264_s7 + $0x1e0] sm:$0xff]  ;;  %v225_v50 = vld [vmem:[%s3264_s7 + $0x48] sm:$0xff]  ;;  %v222_v54 = vld [vmem:[%s3264_s7 + $0x30] sm:$0xff] }
  0x28   : > { %432 = vmatpush.msrb.mxu2 %v304_v33  ;;  %358 = vmatpush.msra.mxu0 %v237_v34  ;;  %v292_v49 = vld [vmem:[%s3264_s7 + $0x260] sm:$0xff]  ;;  %v273_v51 = vld [vmem:[%s3264_s7 + $0x1c8] sm:$0xff]  ;;  %v270_v55 = vld [vmem:[%s3264_s7 + $0x1b0] sm:$0xff] }
  0x29   : > { %378 = vmatpush.msra.mxu1 %v285_v35  ;;  %418 = vmatpush.msra.mxu3 %v238_v36  ;;  %v289_v53 = vld [vmem:[%s3264_s7 + $0x248] sm:$0xff]  ;;  %v223_v56 = vld [vmem:[%s3264_s7 + $0x38] sm:$0xff]  ;;  %v286_v57 = vld [vmem:[%s3264_s7 + $0x230] sm:$0xff] }
  0x2a   : > { %433 = vmatpush.msrb.mxu2 %v301_v37  ;;  %359 = vmatpush.msra.mxu0 %v234_v38  ;;  %v219_v58 = vld [vmem:[%s3264_s7 + $0x18] sm:$0xff]  ;;  %v220_v60 = vld [vmem:[%s3264_s7 + $0x20] sm:$0xff]  ;;  %v217_v1 = vld [vmem:[%s3264_s7 + $0x8] sm:$0xff] }
  0x2b   : > { %379 = vmatpush.msra.mxu1 %v282_v39  ;;  %419 = vmatpush.msra.mxu3 %v235_v40  ;;  %v267_v59 = vld [vmem:[%s3264_s7 + $0x198] sm:$0xff]  ;;  %v216_v62 = vld [vmem:[%s3264_s7] sm:$0xff]  ;;  %v3333_v4 = vld.sshfl [vmem:[#allocation1 + $0x10] sm:$0xff pattern:$0x73625140] }
  0x2c   : > { %434 = vmatpush.msrb.mxu2 %v298_v41  ;;  %360 = vmatpush.msra.mxu0 %v231_v42  ;;  %v283_v61 = vld [vmem:[%s3264_s7 + $0x218] sm:$0xff]  ;;  %v264_v63 = vld [vmem:[%s3264_s7 + $0x180] sm:$0xff]  ;;  %v3337_v6 = vld.sshfl [vmem:[#allocation1 + $0x8] sm:$0xff pattern:$0x73625140] }
  0x2d   : > { %380 = vmatpush.msra.mxu1 %v279_v43  ;;  %420 = vmatpush.msra.mxu3 %v232_v44  ;;  %v280_v2 = vld [vmem:[%s3264_s7 + $0x200] sm:$0xff]  ;;  %v263_v7 = vld [vmem:[%s3264_s7 + $0x178] sm:$0xff]  ;;  %v277_v9 = vld [vmem:[%s3264_s7 + $0x1e8] sm:$0xff] }
  0x2e   : > { %435 = vmatpush.msrb.mxu2 %v295_v45  ;;  %361 = vmatpush.msra.mxu0 %v228_v46  ;;  %v328_v3 = vld [vmem:[%s3264_s7 + $0x380] sm:$0xf]  ;;  %v311_v8 = vld [vmem:[%s3264_s7 + $0x2f8] sm:$0xff]  ;;  %v325_v10 = vld [vmem:[%s3264_s7 + $0x368] sm:$0xff] }
  0x2f   : > { %381 = vmatpush.msra.mxu1 %v276_v47  ;;  %421 = vmatpush.msra.mxu3 %v229_v48  ;;  %v3335_v5 = vld.sshfl [vmem:[#allocation1] sm:$0xff pattern:$0x73625140]  ;;  %v322_v13 = vld [vmem:[%s3264_s7 + $0x350] sm:$0xff]  ;;  %v257_v15 = vld [vmem:[%s3264_s7 + $0x148] sm:$0xff] }
  0x30   : > { %436 = vmatpush.msrb.mxu2 %v292_v49  ;;  %362 = vmatpush.msra.mxu0 %v225_v50  ;;  %670 = vst [vmem:[#allocation1] ss:$4 sm:$0xff] %v3258_v0  ;;  %v260_v11 = vld [vmem:[%s3264_s7 + $0x160] sm:$0xff]  ;;  %v274_v14 = vld [vmem:[%s3264_s7 + $0x1d0] sm:$0xff]  ;;  %v305_v16 = vld [vmem:[%s3264_s7 + $0x2c8] sm:$0xff] }
  0x31   : > { %382 = vmatpush.msra.mxu1 %v273_v51  ;;  %422 = vmatpush.msra.mxu3 %v226_v52  ;;  %v308_v12 = vld [vmem:[%s3264_s7 + $0x2e0] sm:$0xff]  ;;  %v319_v17 = vld [vmem:[%s3264_s7 + $0x338] sm:$0xff]  ;;  %v254_v19 = vld [vmem:[%s3264_s7 + $0x130] sm:$0xff] }
  0x32   : > { %437 = vmatpush.msrb.mxu2 %v289_v53  ;;  %363 = vmatpush.msra.mxu0 %v222_v54  ;;  %v271_v18 = vld [vmem:[%s3264_s7 + $0x1b8] sm:$0xff]  ;;  %v302_v20 = vld [vmem:[%s3264_s7 + $0x2b0] sm:$0xff]  ;;  %v316_v21 = vld [vmem:[%s3264_s7 + $0x320] sm:$0xff] }
  0x33   : > { %383 = vmatpush.msra.mxu1 %v270_v55  ;;  %423 = vmatpush.msra.mxu3 %v223_v56  ;;  %v268_v22 = vld [vmem:[%s3264_s7 + $0x1a0] sm:$0xff]  ;;  %v251_v23 = vld [vmem:[%s3264_s7 + $0x118] sm:$0xff]  ;;  %v313_v25 = vld [vmem:[%s3264_s7 + $0x308] sm:$0xff] }
  0x34   : > { %438 = vmatpush.msrb.mxu2 %v286_v57  ;;  %364 = vmatpush.msra.mxu0 %v219_v58  ;;  %v299_v24 = vld [vmem:[%s3264_s7 + $0x298] sm:$0xff]  ;;  %v265_v26 = vld [vmem:[%s3264_s7 + $0x188] sm:$0xff]  ;;  %v248_v27 = vld [vmem:[%s3264_s7 + $0x100] sm:$0xff] }
  0x35   : > { %384 = vmatpush.msra.mxu1 %v267_v59  ;;  %424 = vmatpush.msra.mxu3 %v220_v60  ;;  %v296_v28 = vld [vmem:[%s3264_s7 + $0x280] sm:$0xff]  ;;  %v329_v29 = vld [vmem:[%s3264_s7 + $0x388] sm:$0xf]  ;;  %v2513_v30 = vld [vmem:[%s3264_s7 + $0x4f8] sm:$0xff] }
  0x36   : > { %439 = vmatpush.msrb.mxu2 %v283_v61  ;;  %365 = vmatpush.msra.mxu0 %v216_v62  ;;  %v245_v31 = vld [vmem:[%s3264_s7 + $0xe8] sm:$0xff]  ;;  %v326_v33 = vld [vmem:[%s3264_s7 + $0x370] sm:$0xff]  ;;  %v2510_v34 = vld [vmem:[%s3264_s7 + $0x4e0] sm:$0xff] }
  0x37   : > { %385 = vmatpush.msra.mxu1 %v264_v63  ;;  %425 = vmatpush.msra.mxu3 %v217_v1  ;;  %v293_v32 = vld [vmem:[%s3264_s7 + $0x268] sm:$0xff]  ;;  %v242_v35 = vld [vmem:[%s3264_s7 + $0xd0] sm:$0xff]  ;;  %v323_v37 = vld [vmem:[%s3264_s7 + $0x358] sm:$0xff] }
  0x38   : > { %440 = vmatpush.msrb.mxu2 %v280_v2  ;;  %2464 = vmatpush.msk.msrb.mxu0 %vm340_vm0, %v328_v3  ;;  %v290_v36 = vld [vmem:[%s3264_s7 + $0x250] sm:$0xff]  ;;  %v2507_v38 = vld [vmem:[%s3264_s7 + $0x4c8] sm:$0xff]  ;;  %v239_v39 = vld [vmem:[%s3264_s7 + $0xb8] sm:$0xff] }
  0x39   : > { %470 = vmatpush.msrb.mxu1 %v263_v7  ;;  %490 = vmatpush.msrb.mxu3 %v311_v8  ;;  %v287_v40 = vld [vmem:[%s3264_s7 + $0x238] sm:$0xff]  ;;  %v320_v41 = vld [vmem:[%s3264_s7 + $0x340] sm:$0xff]  ;;  %v2504_v42 = vld [vmem:[%s3264_s7 + $0x4b0] sm:$0xff] }
  0x3a   : > { %441 = vmatpush.msrb.mxu2 %v277_v9  ;;  %461 = vmatpush.msrb.mxu0 %v325_v10  ;;  %v236_v43 = vld [vmem:[%s3264_s7 + $0xa0] sm:$0xff]  ;;  %v317_v45 = vld [vmem:[%s3264_s7 + $0x328] sm:$0xff]  ;;  %v2501_v46 = vld [vmem:[%s3264_s7 + $0x498] sm:$0xff] }
  0x3b   : > { %471 = vmatpush.msrb.mxu1 %v260_v11  ;;  %491 = vmatpush.msrb.mxu3 %v308_v12  ;;  %v284_v44 = vld [vmem:[%s3264_s7 + $0x220] sm:$0xff]  ;;  %v233_v47 = vld [vmem:[%s3264_s7 + $0x88] sm:$0xff]  ;;  %v314_v49 = vld [vmem:[%s3264_s7 + $0x310] sm:$0xff] }
  0x3c   : > { %2463 = vmatmul.msk.f32.vlgmr.msra.gmra.mxu2 %vm337_vm1, %v3333_v4  ;;  %462 = vmatpush.msrb.mxu0 %v322_v13  ;;  %v281_v48 = vld [vmem:[%s3264_s7 + $0x208] sm:$0xff]  ;;  %v2498_v50 = vld [vmem:[%s3264_s7 + $0x480] sm:$0xff]  ;;  %v230_v51 = vld [vmem:[%s3264_s7 + $0x70] sm:$0xff] }
  0x3d   : > { %442 = vmatpush.msrb.mxu2 %v274_v14  ;;  %472 = vmatpush.msrb.mxu1 %v257_v15  ;;  %v278_v52 = vld [vmem:[%s3264_s7 + $0x1f0] sm:$0xff]  ;;  %v2561_v53 = vld [vmem:[%s3264_s7 + $0x678] sm:$0xff]  ;;  %v2495_v54 = vld [vmem:[%s3264_s7 + $0x468] sm:$0xff] }
  0x3e   : > { %492 = vmatpush.msrb.mxu3 %v305_v16  ;;  %463 = vmatpush.msrb.mxu0 %v319_v17  ;;  %v227_v55 = vld [vmem:[%s3264_s7 + $0x58] sm:$0xff]  ;;  %v2558_v57 = vld [vmem:[%s3264_s7 + $0x660] sm:$0xff]  ;;  %v2492_v58 = vld [vmem:[%s3264_s7 + $0x450] sm:$0xff] }
  0x3f   : > { %443 = vmatpush.msrb.mxu2 %v271_v18  ;;  %473 = vmatpush.msrb.mxu1 %v254_v19  ;;  %v275_v56 = vld [vmem:[%s3264_s7 + $0x1d8] sm:$0xff]  ;;  %v224_v59 = vld [vmem:[%s3264_s7 + $0x40] sm:$0xff]  ;;  %v2555_v61 = vld [vmem:[%s3264_s7 + $0x648] sm:$0xff] }
  0x40   : > { %493 = vmatpush.msrb.mxu3 %v302_v20  ;;  %464 = vmatpush.msrb.mxu0 %v316_v21  ;;  %v272_v60 = vld [vmem:[%s3264_s7 + $0x1c0] sm:$0xff]  ;;  %v2489_v62 = vld [vmem:[%s3264_s7 + $0x438] sm:$0xff]  ;;  %v221_v63 = vld [vmem:[%s3264_s7 + $0x28] sm:$0xff] }
  0x41   : > { %444 = vmatpush.msrb.mxu2 %v268_v22  ;;  %474 = vmatpush.msrb.mxu1 %v251_v23  ;;  %v269_v1 = vld [vmem:[%s3264_s7 + $0x1a8] sm:$0xff]  ;;  %v2552_v2 = vld [vmem:[%s3264_s7 + $0x630] sm:$0xff]  ;;  %v2486_v3 = vld [vmem:[%s3264_s7 + $0x420] sm:$0xff] }
  0x42   : > { %494 = vmatpush.msrb.mxu3 %v299_v24  ;;  %465 = vmatpush.msrb.mxu0 %v313_v25  ;;  %v218_v7 = vld [vmem:[%s3264_s7 + $0x10] sm:$0xff]  ;;  %v2549_v9 = vld [vmem:[%s3264_s7 + $0x618] sm:$0xff]  ;;  %v2483_v10 = vld [vmem:[%s3264_s7 + $0x408] sm:$0xff] }
  0x43   : > { %445 = vmatpush.msrb.mxu2 %v265_v26  ;;  %475 = vmatpush.msrb.mxu1 %v248_v27  ;;  %v266_v8 = vld [vmem:[%s3264_s7 + $0x190] sm:$0xff]  ;;  %v2579_v11 = vld [vmem:[%s3264_s7 + $0x708] sm:$0xf]  ;;  %v2514_v12 = vld [vmem:[%s3264_s7 + $0x500] sm:$0xff] }
  0x44   : > { %495 = vmatpush.msrb.mxu3 %v296_v28  ;;  %366 = vmatmul.f32.vlgmr.msra.gmra.mxu0 %v3335_v5  ;;  %v2546_v13 = vld [vmem:[%s3264_s7 + $0x600] sm:$0xff]  ;;  %v2480_v14 = vld [vmem:[%s3264_s7 + $0x3f0] sm:$0xff]  ;;  %v2511_v16 = vld [vmem:[%s3264_s7 + $0x4e8] sm:$0xff] }
  0x45   : > { %426 = vmatmul.f32.vlgmr.msra.gmra.mxu3 %v3335_v5  ;;  %446 = vmatmul.f32.vlgmr.msrb.gmra.mxu2 %v3337_v6  ;;  %v2576_v15 = vld [vmem:[%s3264_s7 + $0x6f0] sm:$0xff]  ;;  %v2543_v17 = vld [vmem:[%s3264_s7 + $0x5e8] sm:$0xff]  ;;  %v3422_v18 = vld.sshfl [vmem:[#allocation1] sm:$0xff pattern:$0x73625140] }
  0x46   : > { %2466 = vmatpush.msk.msra.mxu0 %vm340_vm0, %v329_v29  ;;  %687 = vmatpush.msra.mxu2 %v2513_v30  ;;  %v3425_v19 = vld.sshfl [vmem:[#allocation1 + $0x8] sm:$0xff pattern:$0x73625140]  ;;  %v3427_v20 = vld.sshfl [vmem:[#allocation1 + $0x10] sm:$0xff pattern:$0x73625140] }
  0x47   : > { %476 = vmatpush.msrb.mxu1 %v245_v31  ;;  %496 = vmatpush.msrb.mxu3 %v293_v32  ;;  %v2477_v21 = vld [vmem:[%s3264_s7 + $0x3d8] sm:$0xff]  ;;  %1000 = vst [vmem:[#allocation1] ss:$4 sm:$0xff] %v3258_v0  ;;  %v2508_v22 = vld [vmem:[%s3264_s7 + $0x4d0] sm:$0xff]  ;;  %v2474_v24 = vld [vmem:[%s3264_s7 + $0x3c0] sm:$0xff] }
  0x48   : > { %521 = vmatpush.msra.mxu0 %v326_v33  ;;  %688 = vmatpush.msra.mxu2 %v2510_v34  ;;  %v2540_v23 = vld [vmem:[%s3264_s7 + $0x5d0] sm:$0xff]  ;;  %v2570_v25 = vld [vmem:[%s3264_s7 + $0x6c0] sm:$0xff]  ;;  %v2505_v26 = vld [vmem:[%s3264_s7 + $0x4b8] sm:$0xff] }
  0x49   : > { %477 = vmatpush.msrb.mxu1 %v242_v35  ;;  %497 = vmatpush.msrb.mxu3 %v290_v36  ;;  %v2537_v27 = vld [vmem:[%s3264_s7 + $0x5b8] sm:$0xff]  ;;  %v2471_v28 = vld [vmem:[%s3264_s7 + $0x3a8] sm:$0xff]  ;;  %v2502_v30 = vld [vmem:[%s3264_s7 + $0x4a0] sm:$0xff] }
  0x4a   : > { %386 = vmatmul.f32.vlgmr.msra.gmra.mxu1 %v3337_v6  ;;  %522 = vmatpush.msra.mxu0 %v323_v37  ;;  %v2567_v29 = vld [vmem:[%s3264_s7 + $0x6a8] sm:$0xff]  ;;  %v2534_v31 = vld [vmem:[%s3264_s7 + $0x5a0] sm:$0xff]  ;;  %v2468_v32 = vld [vmem:[%s3264_s7 + $0x390] sm:$0xff] }
  0x4b   : > { %689 = vmatpush.msra.mxu2 %v2507_v38  ;;  %478 = vmatpush.msrb.mxu1 %v239_v39  ;;  %v2564_v33 = vld [vmem:[%s3264_s7 + $0x690] sm:$0xff]  ;;  %v2531_v34 = vld [vmem:[%s3264_s7 + $0x588] sm:$0xff]  ;;  %v2562_v35 = vld [vmem:[%s3264_s7 + $0x680] sm:$0xff] }
  0x4c   : > { %498 = vmatpush.msrb.mxu3 %v287_v40  ;;  %523 = vmatpush.msra.mxu0 %v320_v41  ;;  %v2580_v36 = vld [vmem:[%s3264_s7 + $0x710] sm:$0xf]  ;;  %v2577_v39 = vld [vmem:[%s3264_s7 + $0x6f8] sm:$0xff] }
  0x4d   : > { %690 = vmatpush.msra.mxu2 %v2504_v42  ;;  %479 = vmatpush.msrb.mxu1 %v236_v43  ;;  %v2496_v37 = vld [vmem:[%s3264_s7 + $0x470] sm:$0xff]  ;;  %v2493_v40 = vld [vmem:[%s3264_s7 + $0x458] sm:$0xff]  ;;  %v2574_v43 = vld [vmem:[%s3264_s7 + $0x6e0] sm:$0xff] }
  0x4e   : > { %499 = vmatpush.msrb.mxu3 %v284_v44  ;;  %2465 = vmatmul.msk.f32.vlgmr.msrb.gmra.mxu0 %vm337_vm1, %v3333_v4  ;;  %v2528_v38 = vld [vmem:[%s3264_s7 + $0x570] sm:$0xff]  ;;  %v2525_v41 = vld [vmem:[%s3264_s7 + $0x558] sm:$0xff]  ;;  %v2490_v44 = vld [vmem:[%s3264_s7 + $0x440] sm:$0xff] }
  0x4f   : > { %524 = vmatpush.msra.mxu0 %v317_v45  ;;  %691 = vmatpush.msra.mxu2 %v2501_v46  ;;  %v2556_v42 = vld [vmem:[%s3264_s7 + $0x650] sm:$0xff]  ;;  %v2522_v45 = vld [vmem:[%s3264_s7 + $0x540] sm:$0xff]  ;;  %v2553_v46 = vld [vmem:[%s3264_s7 + $0x638] sm:$0xff] }
  0x50   : > { %480 = vmatpush.msrb.mxu1 %v233_v47  ;;  %500 = vmatpush.msrb.mxu3 %v281_v48  ;;  %v2571_v47 = vld [vmem:[%s3264_s7 + $0x6c8] sm:$0xff] }
  0x51   : > { %525 = vmatpush.msra.mxu0 %v314_v49  ;;  %692 = vmatpush.msra.mxu2 %v2498_v50  ;;  %v2487_v48 = vld [vmem:[%s3264_s7 + $0x428] sm:$0xff]  ;;  %v2550_v50 = vld [vmem:[%s3264_s7 + $0x620] sm:$0xff] }
  0x52   : > { %481 = vmatpush.msrb.mxu1 %v230_v51  ;;  %501 = vmatpush.msrb.mxu3 %v278_v52  ;;  %v2519_v49 = vld [vmem:[%s3264_s7 + $0x528] sm:$0xff]  ;;  %v2568_v51 = vld [vmem:[%s3264_s7 + $0x6b0] sm:$0xff] }
  0x53   : > { %707 = vmatpush.msrb.mxu0 %v2561_v53  ;;  %693 = vmatpush.msra.mxu2 %v2495_v54  ;;  %v2484_v52 = vld [vmem:[%s3264_s7 + $0x410] sm:$0xff]  ;;  %v2547_v54 = vld [vmem:[%s3264_s7 + $0x608] sm:$0xff] }
  0x54   : > { %482 = vmatpush.msrb.mxu1 %v227_v55  ;;  %502 = vmatpush.msrb.mxu3 %v275_v56  ;;  %v2516_v53 = vld [vmem:[%s3264_s7 + $0x510] sm:$0xff]  ;;  %v2565_v55 = vld [vmem:[%s3264_s7 + $0x698] sm:$0xff] }
  0x55   : > { %708 = vmatpush.msrb.mxu0 %v2558_v57  ;;  %694 = vmatpush.msra.mxu2 %v2492_v58  ;;  %v2481_v56 = vld [vmem:[%s3264_s7 + $0x3f8] sm:$0xff]  ;;  %v2515_v57 = vld [vmem:[%s3264_s7 + $0x508] sm:$0xff] }
  0x56   : > { %483 = vmatpush.msrb.mxu1 %v224_v59  ;;  %503 = vmatpush.msrb.mxu3 %v272_v60  ;;  %v2563_v58 = vld [vmem:[%s3264_s7 + $0x688] sm:$0xff]  ;;  %v2544_v59 = vld [vmem:[%s3264_s7 + $0x5f0] sm:$0xff]  ;;  %v2478_v60 = vld [vmem:[%s3264_s7 + $0x3e0] sm:$0xff] }
  0x57   : > { %709 = vmatpush.msrb.mxu0 %v2555_v61  ;;  %695 = vmatpush.msra.mxu2 %v2489_v62  ;;  %v2512_v61 = vld [vmem:[%s3264_s7 + $0x4f0] sm:$0xff] }
  0x58   : > { %484 = vmatpush.msrb.mxu1 %v221_v63  ;;  %504 = vmatpush.msrb.mxu3 %v269_v1  ;;  %v2560_v62 = vld [vmem:[%s3264_s7 + $0x670] sm:$0xff]  ;;  %v2541_v63 = vld [vmem:[%s3264_s7 + $0x5d8] sm:$0xff]  ;;  %v2475_v1 = vld [vmem:[%s3264_s7 + $0x3c8] sm:$0xff] }
  0x59   : > { %710 = vmatpush.msrb.mxu0 %v2552_v2  ;;  %696 = vmatpush.msra.mxu2 %v2486_v3  ;;  %v2509_v2 = vld [vmem:[%s3264_s7 + $0x4d8] sm:$0xff] }
  0x5a   : > { %485 = vmatpush.msrb.mxu1 %v218_v7  ;;  %505 = vmatpush.msrb.mxu3 %v266_v8  ;;  %v2557_v3 = vld [vmem:[%s3264_s7 + $0x658] sm:$0xff]  ;;  %v2538_v7 = vld [vmem:[%s3264_s7 + $0x5c0] sm:$0xff]  ;;  %v2472_v8 = vld [vmem:[%s3264_s7 + $0x3b0] sm:$0xff] }
  0x5b   : > { %711 = vmatpush.msrb.mxu0 %v2549_v9  ;;  %506 = vmatmul.f32.vlgmr.msrb.gmra.mxu3 %v3337_v6  ;;  %v2573_v6 = vld [vmem:[%s3264_s7 + $0x6d8] sm:$0xff]  ;;  %v2506_v9 = vld [vmem:[%s3264_s7 + $0x4c0] sm:$0xff] }
  0x5c   : > { %697 = vmatpush.msra.mxu2 %v2483_v10  ;;  %2582 = vmatpush.msk.msra.mxu1 %vm340_vm0, %v2579_v11  ;;  %v2554_v10 = vld [vmem:[%s3264_s7 + $0x640] sm:$0xff]  ;;  %v2535_v11 = vld [vmem:[%s3264_s7 + $0x5a8] sm:$0xff] }
  0x5d   : > { %747 = vmatpush.msra.mxu3 %v2514_v12  ;;  %712 = vmatpush.msrb.mxu0 %v2546_v13  ;;  %v2469_v12 = vld [vmem:[%s3264_s7 + $0x398] sm:$0xff]  ;;  %v2503_v13 = vld [vmem:[%s3264_s7 + $0x4a8] sm:$0xff] }
  0x5e   : > { %698 = vmatpush.msra.mxu2 %v2480_v14  ;;  %738 = vmatpush.msra.mxu1 %v2576_v15  ;;  %v2551_v14 = vld [vmem:[%s3264_s7 + $0x628] sm:$0xff]  ;;  %v2532_v15 = vld [vmem:[%s3264_s7 + $0x590] sm:$0xff] }
  0x5f   : > { %748 = vmatpush.msra.mxu3 %v2511_v16  ;;  %713 = vmatpush.msrb.mxu0 %v2543_v17  ;;  %v2581_v16 = vld [vmem:[%s3264_s7 + $0x718] sm:$0xf]  ;;  %v2500_v17 = vld [vmem:[%s3264_s7 + $0x490] sm:$0xff] }
  0x60   : > { %699 = vmatpush.msra.mxu2 %v2477_v21  ;;  %739 = vmatpush.msra.mxu1 %v2573_v6  ;;  %v2548_v21 = vld [vmem:[%s3264_s7 + $0x610] sm:$0xff]  ;;  %v2529_v6 = vld [vmem:[%s3264_s7 + $0x578] sm:$0xff] }
  0x61   : > { %749 = vmatpush.msra.mxu3 %v2508_v22  ;;  %714 = vmatpush.msrb.mxu0 %v2540_v23  ;;  %v2578_v22 = vld [vmem:[%s3264_s7 + $0x700] sm:$0xff]  ;;  %v2497_v23 = vld [vmem:[%s3264_s7 + $0x478] sm:$0xff] }
  0x62   : > { %486 = vmatmul.f32.vlgmr.msrb.gmra.mxu1 %v3335_v5  ;;  %700 = vmatpush.msra.mxu2 %v2474_v24  ;;  %v2499_v5 = vld [vmem:[%s3264_s7 + $0x488] sm:$0xff]  ;;  %v2545_v24 = vld [vmem:[%s3264_s7 + $0x5f8] sm:$0xff] }
  0x63   : > { %740 = vmatpush.msra.mxu1 %v2570_v25  ;;  %750 = vmatpush.msra.mxu3 %v2505_v26  ;;  %v2526_v25 = vld [vmem:[%s3264_s7 + $0x560] sm:$0xff]  ;;  %v2575_v26 = vld [vmem:[%s3264_s7 + $0x6e8] sm:$0xff] }
  0x64   : > { %715 = vmatpush.msrb.mxu0 %v2537_v27  ;;  %701 = vmatpush.msra.mxu2 %v2471_v28  ;;  %v2494_v27 = vld [vmem:[%s3264_s7 + $0x460] sm:$0xff] }
  0x65   : > { %2467 = vmatmul.msk.f32.vlgmr.msra.gmra.mxu0 %vm337_vm1, %v3333_v4  ;;  %741 = vmatpush.msra.mxu1 %v2567_v29  ;;  %v2559_v4 = vld [vmem:[%s3264_s7 + $0x668] sm:$0xff]  ;;  %v2542_v28 = vld [vmem:[%s3264_s7 + $0x5e0] sm:$0xff] }
  0x66   : > { %751 = vmatpush.msra.mxu3 %v2502_v30  ;;  %716 = vmatpush.msrb.mxu0 %v2534_v31  ;;  %v2523_v29 = vld [vmem:[%s3264_s7 + $0x548] sm:$0xff]  ;;  %v2572_v30 = vld [vmem:[%s3264_s7 + $0x6d0] sm:$0xff] }
  0x67   : > { %702 = vmatpush.msra.mxu2 %v2468_v32  ;;  %742 = vmatpush.msra.mxu1 %v2564_v33  ;;  %v2491_v31 = vld [vmem:[%s3264_s7 + $0x448] sm:$0xff]  ;;  %v2520_v33 = vld [vmem:[%s3264_s7 + $0x530] sm:$0xff] }
  0x68   : > { %752 = vmatpush.msra.mxu3 %v2499_v5  ;;  %717 = vmatpush.msrb.mxu0 %v2531_v34  ;;  %v2539_v32 = vld [vmem:[%s3264_s7 + $0x5c8] sm:$0xff]  ;;  %v2569_v5 = vld [vmem:[%s3264_s7 + $0x6b8] sm:$0xff]  ;;  %v2488_v34 = vld [vmem:[%s3264_s7 + $0x430] sm:$0xff] }
  0x69   : > { %767 = vmatpush.msrb.mxu1 %v2562_v35  ;;  %2584 = vmatpush.msk.msrb.mxu2 %vm340_vm0, %v2580_v36  ;;  %v2536_v35 = vld [vmem:[%s3264_s7 + $0x5b0] sm:$0xff]  ;;  %v2517_v36 = vld [vmem:[%s3264_s7 + $0x518] sm:$0xff] }
  0x6a   : > { %753 = vmatpush.msra.mxu3 %v2496_v37  ;;  %718 = vmatpush.msrb.mxu0 %v2528_v38  ;;  %v2566_v37 = vld [vmem:[%s3264_s7 + $0x6a0] sm:$0xff]  ;;  %v2485_v38 = vld [vmem:[%s3264_s7 + $0x418] sm:$0xff] }
  0x6b   : > { %768 = vmatpush.msrb.mxu1 %v2559_v4  ;;  %798 = vmatpush.msrb.mxu2 %v2577_v39  ;;  %v2533_v4 = vld [vmem:[%s3264_s7 + $0x598] sm:$0xff]  ;;  %v2633_v39 = vld [vmem:[%s3264_s7 + $0x888] sm:$0xff] }
  0x6c   : > { %754 = vmatpush.msra.mxu3 %v2493_v40  ;;  %719 = vmatpush.msrb.mxu0 %v2525_v41  ;;  %v2681_v40 = vld [vmem:[%s3264_s7 + $0xa08] sm:$0xff]  ;;  %v2482_v41 = vld [vmem:[%s3264_s7 + $0x400] sm:$0xff] }
  0x6d   : > { %769 = vmatpush.msrb.mxu1 %v2556_v42  ;;  %799 = vmatpush.msrb.mxu2 %v2574_v43  ;;  %v2530_v42 = vld [vmem:[%s3264_s7 + $0x580] sm:$0xff]  ;;  %v2630_v43 = vld [vmem:[%s3264_s7 + $0x870] sm:$0xff] }
  0x6e   : > { %755 = vmatpush.msra.mxu3 %v2490_v44  ;;  %720 = vmatpush.msrb.mxu0 %v2522_v45  ;;  %v2678_v44 = vld [vmem:[%s3264_s7 + $0x9f0] sm:$0xff]  ;;  %v2479_v45 = vld [vmem:[%s3264_s7 + $0x3e8] sm:$0xff] }
  0x6f   : > { %770 = vmatpush.msrb.mxu1 %v2553_v46  ;;  %800 = vmatpush.msrb.mxu2 %v2571_v47  ;;  %v2527_v46 = vld [vmem:[%s3264_s7 + $0x568] sm:$0xff]  ;;  %v2627_v47 = vld [vmem:[%s3264_s7 + $0x858] sm:$0xff] }
  0x70   : > { %756 = vmatpush.msra.mxu3 %v2487_v48  ;;  %721 = vmatpush.msrb.mxu0 %v2519_v49  ;;  %v2675_v48 = vld [vmem:[%s3264_s7 + $0x9d8] sm:$0xff]  ;;  %v2476_v49 = vld [vmem:[%s3264_s7 + $0x3d0] sm:$0xff] }
  0x71   : > { %771 = vmatpush.msrb.mxu1 %v2550_v50  ;;  %801 = vmatpush.msrb.mxu2 %v2568_v51  ;;  %v2524_v50 = vld [vmem:[%s3264_s7 + $0x550] sm:$0xff]  ;;  %v2624_v51 = vld [vmem:[%s3264_s7 + $0x840] sm:$0xff] }
  0x72   : > { %757 = vmatpush.msra.mxu3 %v2484_v52  ;;  %722 = vmatpush.msrb.mxu0 %v2516_v53  ;;  %v2672_v52 = vld [vmem:[%s3264_s7 + $0x9c0] sm:$0xff]  ;;  %v2473_v53 = vld [vmem:[%s3264_s7 + $0x3b8] sm:$0xff] }
  0x73   : > { %772 = vmatpush.msrb.mxu1 %v2547_v54  ;;  %802 = vmatpush.msrb.mxu2 %v2565_v55  ;;  %v2521_v54 = vld [vmem:[%s3264_s7 + $0x538] sm:$0xff]  ;;  %v2621_v55 = vld [vmem:[%s3264_s7 + $0x828] sm:$0xff] }
  0x74   : > { %703 = vmatmul.f32.vlgmr.msra.gmra.mxu2 %v3422_v18  ;;  %758 = vmatpush.msra.mxu3 %v2481_v56  ;;  %v2669_v56 = vld [vmem:[%s3264_s7 + $0x9a8] sm:$0xff] }
  0x75   : > { %807 = vmatpush.msra.mxu0 %v2515_v57  ;;  %827 = vmatpush.msra.mxu2 %v2563_v58  ;;  %v2470_v57 = vld [vmem:[%s3264_s7 + $0x3a0] sm:$0xff] }
  0x76   : > { %773 = vmatpush.msrb.mxu1 %v2544_v59  ;;  %759 = vmatpush.msra.mxu3 %v2478_v60  ;;  %v2518_v58 = vld [vmem:[%s3264_s7 + $0x520] sm:$0xff]  ;;  %v2618_v59 = vld [vmem:[%s3264_s7 + $0x810] sm:$0xff] }
  0x77   : > { %808 = vmatpush.msra.mxu0 %v2512_v61  ;;  %828 = vmatpush.msra.mxu2 %v2560_v62  ;;  %v2666_v60 = vld [vmem:[%s3264_s7 + $0x990] sm:$0xff]  ;;  %v2699_v61 = vld [vmem:[%s3264_s7 + $0xa98] sm:$0xf] }
  0x78   : > { %774 = vmatpush.msrb.mxu1 %v2541_v63  ;;  %760 = vmatpush.msra.mxu3 %v2475_v1  ;;  %v2634_v62 = vld [vmem:[%s3264_s7 + $0x890] sm:$0xff]  ;;  %v2615_v63 = vld [vmem:[%s3264_s7 + $0x7f8] sm:$0xff] }
  0x79   : > { %809 = vmatpush.msra.mxu0 %v2509_v2  ;;  %829 = vmatpush.msra.mxu2 %v2557_v3  ;;  %v2663_v1 = vld [vmem:[%s3264_s7 + $0x978] sm:$0xff]  ;;  %v2696_v2 = vld [vmem:[%s3264_s7 + $0xa80] sm:$0xff] }
  0x7a   : > { %775 = vmatpush.msrb.mxu1 %v2538_v7  ;;  %723 = vmatmul.f32.vlgmr.msrb.gmra.mxu0 %v3425_v19  ;;  %v2631_v3 = vld [vmem:[%s3264_s7 + $0x878] sm:$0xff]  ;;  %v2612_v7 = vld [vmem:[%s3264_s7 + $0x7e0] sm:$0xff] }
  0x7b   : > { %761 = vmatpush.msra.mxu3 %v2472_v8  ;;  %810 = vmatpush.msra.mxu0 %v2506_v9  ;;  %v2660_v8 = vld [vmem:[%s3264_s7 + $0x960] sm:$0xff]  ;;  %v2693_v9 = vld [vmem:[%s3264_s7 + $0xa68] sm:$0xff] }
  0x7c   : > { %830 = vmatpush.msra.mxu2 %v2554_v10  ;;  %776 = vmatpush.msrb.mxu1 %v2535_v11  ;;  %v2609_v10 = vld [vmem:[%s3264_s7 + $0x7c8] sm:$0xff] }
  0x7d   : > { %2583 = vmatmul.msk.f32.vlgmr.msra.gmra.mxu1 %vm337_vm1, %v3427_v20  ;;  %762 = vmatpush.msra.mxu3 %v2469_v12  ;;  %v2657_v11 = vld [vmem:[%s3264_s7 + $0x948] sm:$0xff]  ;;  %v2690_v12 = vld [vmem:[%s3264_s7 + $0xa50] sm:$0xff] }
  0x7e   : > { %811 = vmatpush.msra.mxu0 %v2503_v13  ;;  %831 = vmatpush.msra.mxu2 %v2551_v14  ;;  %v2625_v13 = vld [vmem:[%s3264_s7 + $0x848] sm:$0xff]  ;;  %v2654_v14 = vld [vmem:[%s3264_s7 + $0x930] sm:$0xff] }
  0x7f   : > { %777 = vmatpush.msrb.mxu1 %v2532_v15  ;;  %2586 = vmatpush.msk.msrb.mxu3 %vm340_vm0, %v2581_v16  ;;  %v2687_v15 = vld [vmem:[%s3264_s7 + $0xa38] sm:$0xff]  ;;  %v2622_v16 = vld [vmem:[%s3264_s7 + $0x830] sm:$0xff] }
  0x80   : > { %812 = vmatpush.msra.mxu0 %v2500_v17  ;;  %832 = vmatpush.msra.mxu2 %v2548_v21  ;;  %v2603_v17 = vld [vmem:[%s3264_s7 + $0x798] sm:$0xff] }
  0x81   : > { %778 = vmatpush.msrb.mxu1 %v2529_v6  ;;  %858 = vmatpush.msrb.mxu3 %v2578_v22  ;;  %v2651_v21 = vld [vmem:[%s3264_s7 + $0x918] sm:$0xff]  ;;  %v2684_v6 = vld [vmem:[%s3264_s7 + $0xa20] sm:$0xff] }
  0x82   : > { %813 = vmatpush.msra.mxu0 %v2497_v23  ;;  %833 = vmatpush.msra.mxu2 %v2545_v24  ;;  %v2619_v22 = vld [vmem:[%s3264_s7 + $0x818] sm:$0xff]  ;;  %v2600_v23 = vld [vmem:[%s3264_s7 + $0x780] sm:$0xff] }
  0x83   : > { %779 = vmatpush.msrb.mxu1 %v2526_v25  ;;  %859 = vmatpush.msrb.mxu3 %v2575_v26  ;;  %v2648_v24 = vld [vmem:[%s3264_s7 + $0x900] sm:$0xff]  ;;  %v2597_v26 = vld [vmem:[%s3264_s7 + $0x768] sm:$0xff] }
  0x84   : > { %763 = vmatmul.f32.vlgmr.msra.gmra.mxu3 %v3422_v18  ;;  %814 = vmatpush.msra.mxu0 %v2494_v27  ;;  %v2616_v25 = vld [vmem:[%s3264_s7 + $0x800] sm:$0xff]  ;;  %v2645_v27 = vld [vmem:[%s3264_s7 + $0x8e8] sm:$0xff] }
  0x85   : > { %834 = vmatpush.msra.mxu2 %v2542_v28  ;;  %780 = vmatpush.msrb.mxu1 %v2523_v29  ;;  %v3579_v28 = vld.sshfl [vmem:[#allocation1] sm:$0xff pattern:$0x73625140]  ;;  %v3581_v29 = vld.sshfl [vmem:[#allocation1 + $0x10] sm:$0xff pattern:$0x73625140] }
  0x86   : > { %860 = vmatpush.msrb.mxu3 %v2572_v30  ;;  %2585 = vmatmul.msk.f32.vlgmr.msrb.gmra.mxu2 %vm337_vm1, %v3427_v20  ;;  %v3583_v30 = vld.sshfl [vmem:[#allocation1 + $0x8] sm:$0xff pattern:$0x73625140] }
  0x87   : > { %815 = vmatpush.msra.mxu0 %v2491_v31  ;;  %835 = vmatpush.msra.mxu2 %v2539_v32  ;;  %v2679_v31 = vld [vmem:[%s3264_s7 + $0x9f8] sm:$0xff]  ;;  %v2613_v32 = vld [vmem:[%s3264_s7 + $0x7e8] sm:$0xff]  ;;  %1330 = vst [vmem:[#allocation1] ss:$4 sm:$0xff] %v3258_v0 }
  0x88   : > { %781 = vmatpush.msrb.mxu1 %v2520_v33  ;;  %861 = vmatpush.msrb.mxu3 %v2569_v5  ;;  %v2594_v33 = vld [vmem:[%s3264_s7 + $0x750] sm:$0xff] }
  0x89   : > { %816 = vmatpush.msra.mxu0 %v2488_v34  ;;  %836 = vmatpush.msra.mxu2 %v2536_v35  ;;  %v2642_v5 = vld [vmem:[%s3264_s7 + $0x8d0] sm:$0xff]  ;;  %v2676_v34 = vld [vmem:[%s3264_s7 + $0x9e0] sm:$0xff] }
  0x8a   : > { %782 = vmatpush.msrb.mxu1 %v2517_v36  ;;  %862 = vmatpush.msrb.mxu3 %v2566_v37  ;;  %v2610_v35 = vld [vmem:[%s3264_s7 + $0x7d0] sm:$0xff]  ;;  %v2591_v36 = vld [vmem:[%s3264_s7 + $0x738] sm:$0xff] }
  0x8b   : > { %783 = vmatmul.f32.vlgmr.msrb.gmra.mxu1 %v3425_v19  ;;  %817 = vmatpush.msra.mxu0 %v2485_v38  ;;  %v2639_v37 = vld [vmem:[%s3264_s7 + $0x8b8] sm:$0xff]  ;;  %v2673_v38 = vld [vmem:[%s3264_s7 + $0x9c8] sm:$0xff] }
  0x8c   : > { %837 = vmatpush.msra.mxu2 %v2533_v4  ;;  %1017 = vmatpush.msra.mxu1 %v2633_v39  ;;  %v2607_v4 = vld [vmem:[%s3264_s7 + $0x7b8] sm:$0xff]  ;;  %v2588_v39 = vld [vmem:[%s3264_s7 + $0x720] sm:$0xff] }
  0x8d   : > { %1037 = vmatpush.msra.mxu3 %v2681_v40  ;;  %818 = vmatpush.msra.mxu0 %v2482_v41  ;;  %v2636_v40 = vld [vmem:[%s3264_s7 + $0x8a0] sm:$0xff]  ;;  %v2670_v41 = vld [vmem:[%s3264_s7 + $0x9b0] sm:$0xff] }
  0x8e   : > { %838 = vmatpush.msra.mxu2 %v2530_v42  ;;  %1018 = vmatpush.msra.mxu1 %v2630_v43  ;;  %v2604_v42 = vld [vmem:[%s3264_s7 + $0x7a0] sm:$0xff] }
  0x8f   : > { %1038 = vmatpush.msra.mxu3 %v2678_v44  ;;  %819 = vmatpush.msra.mxu0 %v2479_v45  ;;  %v2700_v43 = vld [vmem:[%s3264_s7 + $0xaa0] sm:$0xf]  ;;  %v2635_v44 = vld [vmem:[%s3264_s7 + $0x898] sm:$0xff] }
  0x90   : > { %839 = vmatpush.msra.mxu2 %v2527_v46  ;;  %1019 = vmatpush.msra.mxu1 %v2627_v47  ;;  %v2667_v45 = vld [vmem:[%s3264_s7 + $0x998] sm:$0xff]  ;;  %v2601_v46 = vld [vmem:[%s3264_s7 + $0x788] sm:$0xff] }
  0x91   : > { %1039 = vmatpush.msra.mxu3 %v2675_v48  ;;  %820 = vmatpush.msra.mxu0 %v2476_v49  ;;  %v2697_v47 = vld [vmem:[%s3264_s7 + $0xa88] sm:$0xff]  ;;  %v2632_v48 = vld [vmem:[%s3264_s7 + $0x880] sm:$0xff] }
  0x92   : > { %840 = vmatpush.msra.mxu2 %v2524_v50  ;;  %1020 = vmatpush.msra.mxu1 %v2624_v51  ;;  %v2664_v49 = vld [vmem:[%s3264_s7 + $0x980] sm:$0xff]  ;;  %v2598_v50 = vld [vmem:[%s3264_s7 + $0x770] sm:$0xff] }
  0x93   : > { %1040 = vmatpush.msra.mxu3 %v2672_v52  ;;  %821 = vmatpush.msra.mxu0 %v2473_v53  ;;  %v2694_v51 = vld [vmem:[%s3264_s7 + $0xa70] sm:$0xff]  ;;  %v2629_v52 = vld [vmem:[%s3264_s7 + $0x868] sm:$0xff] }
  0x94   : > { %841 = vmatpush.msra.mxu2 %v2521_v54  ;;  %1021 = vmatpush.msra.mxu1 %v2621_v55  ;;  %v2661_v53 = vld [vmem:[%s3264_s7 + $0x968] sm:$0xff]  ;;  %v2595_v54 = vld [vmem:[%s3264_s7 + $0x758] sm:$0xff] }
  0x95   : > { %1041 = vmatpush.msra.mxu3 %v2669_v56  ;;  %822 = vmatpush.msra.mxu0 %v2470_v57  ;;  %v2691_v55 = vld [vmem:[%s3264_s7 + $0xa58] sm:$0xff]  ;;  %v2626_v56 = vld [vmem:[%s3264_s7 + $0x850] sm:$0xff] }
  0x96   : > { %842 = vmatpush.msra.mxu2 %v2518_v58  ;;  %1022 = vmatpush.msra.mxu1 %v2618_v59  ;;  %v2658_v57 = vld [vmem:[%s3264_s7 + $0x950] sm:$0xff]  ;;  %v2592_v58 = vld [vmem:[%s3264_s7 + $0x740] sm:$0xff] }
  0x97   : > { %1042 = vmatpush.msra.mxu3 %v2666_v60  ;;  %843 = vmatmul.f32.vlgmr.msra.gmra.mxu2 %v3425_v19  ;;  %v2628_v19 = vld [vmem:[%s3264_s7 + $0x860] sm:$0xff]  ;;  %v2623_v60 = vld [vmem:[%s3264_s7 + $0x838] sm:$0xff] }
  0x98   : > { %2702 = vmatpush.msk.msrb.mxu0 %vm340_vm0, %v2699_v61  ;;  %1077 = vmatpush.msrb.mxu2 %v2634_v62  ;;  %v2688_v59 = vld [vmem:[%s3264_s7 + $0xa40] sm:$0xff]  ;;  %v2655_v61 = vld [vmem:[%s3264_s7 + $0x938] sm:$0xff]  ;;  %v2589_v62 = vld [vmem:[%s3264_s7 + $0x728] sm:$0xff] }
  0x99   : > { %1023 = vmatpush.msra.mxu1 %v2615_v63  ;;  %1043 = vmatpush.msra.mxu3 %v2663_v1  ;;  %v2685_v63 = vld [vmem:[%s3264_s7 + $0xa28] sm:$0xff]  ;;  %v2620_v1 = vld [vmem:[%s3264_s7 + $0x820] sm:$0xff] }
  0x9a   : > { %2587 = vmatmul.msk.f32.vlgmr.msrb.gmra.mxu3 %vm337_vm1, %v3427_v20  ;;  %1068 = vmatpush.msrb.mxu0 %v2696_v2  ;;  %v2606_v20 = vld [vmem:[%s3264_s7 + $0x7b0] sm:$0xff]  ;;  %v2652_v2 = vld [vmem:[%s3264_s7 + $0x920] sm:$0xff] }
  0x9b   : > { %1078 = vmatpush.msrb.mxu2 %v2631_v3  ;;  %1024 = vmatpush.msra.mxu1 %v2612_v7  ;;  %v2683_v3 = vld [vmem:[%s3264_s7 + $0xa18] sm:$0xff]  ;;  %v2701_v7 = vld [vmem:[%s3264_s7 + $0xaa8] sm:$0xf] }
  0x9c   : > { %1044 = vmatpush.msra.mxu3 %v2660_v8  ;;  %1069 = vmatpush.msrb.mxu0 %v2693_v9  ;;  %v2617_v8 = vld [vmem:[%s3264_s7 + $0x808] sm:$0xff] }
  0x9d   : > { %1079 = vmatpush.msrb.mxu2 %v2628_v19  ;;  %1025 = vmatpush.msra.mxu1 %v2609_v10  ;;  %v2649_v9 = vld [vmem:[%s3264_s7 + $0x908] sm:$0xff]  ;;  %v2680_v19 = vld [vmem:[%s3264_s7 + $0xa00] sm:$0xff]  ;;  %v2698_v10 = vld [vmem:[%s3264_s7 + $0xa90] sm:$0xff] }
  0x9e   : > { %1045 = vmatpush.msra.mxu3 %v2657_v11  ;;  %823 = vmatmul.f32.vlgmr.msra.gmra.mxu0 %v3422_v18  ;;  %v2682_v18 = vld [vmem:[%s3264_s7 + $0xa10] sm:$0xff] }
  0x9f   : > { %1070 = vmatpush.msrb.mxu0 %v2690_v12  ;;  %1080 = vmatpush.msrb.mxu2 %v2625_v13  ;;  %v2614_v11 = vld [vmem:[%s3264_s7 + $0x7f0] sm:$0xff]  ;;  %v2677_v13 = vld [vmem:[%s3264_s7 + $0x9e8] sm:$0xff] }
  0xa0   : > { %1026 = vmatpush.msra.mxu1 %v2606_v20  ;;  %1046 = vmatpush.msra.mxu3 %v2654_v14  ;;  %v2646_v12 = vld [vmem:[%s3264_s7 + $0x8f0] sm:$0xff]  ;;  %v2695_v20 = vld [vmem:[%s3264_s7 + $0xa78] sm:$0xff] }
  0xa1   : > { %1071 = vmatpush.msrb.mxu0 %v2687_v15  ;;  %1081 = vmatpush.msrb.mxu2 %v2622_v16  ;;  %v2611_v14 = vld [vmem:[%s3264_s7 + $0x7d8] sm:$0xff]  ;;  %v2674_v16 = vld [vmem:[%s3264_s7 + $0x9d0] sm:$0xff] }
  0xa2   : > { %1027 = vmatpush.msra.mxu1 %v2603_v17  ;;  %1047 = vmatpush.msra.mxu3 %v2651_v21  ;;  %v2643_v15 = vld [vmem:[%s3264_s7 + $0x8d8] sm:$0xff]  ;;  %v2692_v17 = vld [vmem:[%s3264_s7 + $0xa60] sm:$0xff] }
  0xa3   : > { %1072 = vmatpush.msrb.mxu0 %v2684_v6  ;;  %1082 = vmatpush.msrb.mxu2 %v2619_v22  ;;  %v2608_v21 = vld [vmem:[%s3264_s7 + $0x7c0] sm:$0xff]  ;;  %v2671_v22 = vld [vmem:[%s3264_s7 + $0x9b8] sm:$0xff] }
  0xa4   : > { %1028 = vmatpush.msra.mxu1 %v2600_v23  ;;  %1048 = vmatpush.msra.mxu3 %v2648_v24  ;;  %v2640_v6 = vld [vmem:[%s3264_s7 + $0x8c0] sm:$0xff]  ;;  %v2689_v23 = vld [vmem:[%s3264_s7 + $0xa48] sm:$0xff] }
  0xa5   : > { %1097 = vmatpush.msra.mxu0 %v2682_v18  ;;  %1083 = vmatpush.msrb.mxu2 %v2616_v25  ;;  %v2637_v24 = vld [vmem:[%s3264_s7 + $0x8a8] sm:$0xff]  ;;  %v2668_v25 = vld [vmem:[%s3264_s7 + $0x9a0] sm:$0xff] }
  0xa6   : > { %1029 = vmatpush.msra.mxu1 %v2597_v26  ;;  %1049 = vmatpush.msra.mxu3 %v2645_v27  ;;  %v2605_v18 = vld [vmem:[%s3264_s7 + $0x7a8] sm:$0xff]  ;;  %v2686_v26 = vld [vmem:[%s3264_s7 + $0xa30] sm:$0xff]  ;;  %v2753_v27 = vld [vmem:[%s3264_s7 + $0xc18] sm:$0xff] }
  0xa7   : > { %1098 = vmatpush.msra.mxu0 %v2679_v31  ;;  %1084 = vmatpush.msrb.mxu2 %v2613_v32  ;;  %v2602_v31 = vld [vmem:[%s3264_s7 + $0x790] sm:$0xff]  ;;  %v2801_v32 = vld [vmem:[%s3264_s7 + $0xd98] sm:$0xff] }
  0xa8   : > { %1030 = vmatpush.msra.mxu1 %v2594_v33  ;;  %1050 = vmatpush.msra.mxu3 %v2642_v5  ;;  %v2665_v33 = vld [vmem:[%s3264_s7 + $0x988] sm:$0xff]  ;;  %v2599_v5 = vld [vmem:[%s3264_s7 + $0x778] sm:$0xff] }
  0xa9   : > { %1099 = vmatpush.msra.mxu0 %v2676_v34  ;;  %1085 = vmatpush.msrb.mxu2 %v2610_v35  ;;  %v2750_v34 = vld [vmem:[%s3264_s7 + $0xc00] sm:$0xff] }
  0xaa   : > { %1031 = vmatpush.msra.mxu1 %v2591_v36  ;;  %1051 = vmatpush.msra.mxu3 %v2639_v37  ;;  %v2798_v35 = vld [vmem:[%s3264_s7 + $0xd80] sm:$0xff]  ;;  %v2662_v36 = vld [vmem:[%s3264_s7 + $0x970] sm:$0xff] }
  0xab   : > { %1100 = vmatpush.msra.mxu0 %v2673_v38  ;;  %1086 = vmatpush.msrb.mxu2 %v2607_v4  ;;  %v2596_v37 = vld [vmem:[%s3264_s7 + $0x760] sm:$0xff]  ;;  %v2747_v38 = vld [vmem:[%s3264_s7 + $0xbe8] sm:$0xff] }
  0xac   : > { %1032 = vmatpush.msra.mxu1 %v2588_v39  ;;  %1052 = vmatpush.msra.mxu3 %v2636_v40  ;;  %v2795_v4 = vld [vmem:[%s3264_s7 + $0xd68] sm:$0xff]  ;;  %v2659_v39 = vld [vmem:[%s3264_s7 + $0x958] sm:$0xff] }
  0xad   : > { %1101 = vmatpush.msra.mxu0 %v2670_v41  ;;  %1087 = vmatpush.msrb.mxu2 %v2604_v42  ;;  %v2593_v40 = vld [vmem:[%s3264_s7 + $0x748] sm:$0xff]  ;;  %v2744_v41 = vld [vmem:[%s3264_s7 + $0xbd0] sm:$0xff] }
  0xae   : > { %2704 = vmatpush.msk.msrb.mxu1 %vm340_vm0, %v2700_v43  ;;  %1137 = vmatpush.msrb.mxu3 %v2635_v44  ;;  %v2792_v42 = vld [vmem:[%s3264_s7 + $0xd50] sm:$0xff]  ;;  %v2656_v43 = vld [vmem:[%s3264_s7 + $0x940] sm:$0xff] }
  0xaf   : > { %1102 = vmatpush.msra.mxu0 %v2667_v45  ;;  %1088 = vmatpush.msrb.mxu2 %v2601_v46  ;;  %v2590_v44 = vld [vmem:[%s3264_s7 + $0x730] sm:$0xff]  ;;  %v2741_v46 = vld [vmem:[%s3264_s7 + $0xbb8] sm:$0xff] }
  0xb0   : > { %1128 = vmatpush.msrb.mxu1 %v2697_v47  ;;  %1138 = vmatpush.msrb.mxu3 %v2632_v48  ;;  %v2789_v47 = vld [vmem:[%s3264_s7 + $0xd38] sm:$0xff]  ;;  %v2653_v48 = vld [vmem:[%s3264_s7 + $0x928] sm:$0xff] }
  0xb1   : > { %1103 = vmatpush.msra.mxu0 %v2664_v49  ;;  %1089 = vmatpush.msrb.mxu2 %v2598_v50  ;;  %v2819_v49 = vld [vmem:[%s3264_s7 + $0xe28] sm:$0xf]  ;;  %v2738_v50 = vld [vmem:[%s3264_s7 + $0xba0] sm:$0xff] }
  0xb2   : > { %1129 = vmatpush.msrb.mxu1 %v2694_v51  ;;  %1139 = vmatpush.msrb.mxu3 %v2629_v52  ;;  %v2786_v51 = vld [vmem:[%s3264_s7 + $0xd20] sm:$0xff] }
  0xb3   : > { %1104 = vmatpush.msra.mxu0 %v2661_v53  ;;  %1090 = vmatpush.msrb.mxu2 %v2595_v54  ;;  %v2650_v53 = vld [vmem:[%s3264_s7 + $0x910] sm:$0xff] }
  0xb4   : > { %1130 = vmatpush.msrb.mxu1 %v2691_v55  ;;  %1140 = vmatpush.msrb.mxu3 %v2626_v56  ;;  %v2816_v54 = vld [vmem:[%s3264_s7 + $0xe10] sm:$0xff]  ;;  %v2735_v55 = vld [vmem:[%s3264_s7 + $0xb88] sm:$0xff] }
  0xb5   : > { %1105 = vmatpush.msra.mxu0 %v2658_v57  ;;  %1091 = vmatpush.msrb.mxu2 %v2592_v58  ;;  %v2783_v56 = vld [vmem:[%s3264_s7 + $0xd08] sm:$0xff]  ;;  %v2647_v57 = vld [vmem:[%s3264_s7 + $0x8f8] sm:$0xff] }
  0xb6   : > { %1131 = vmatpush.msrb.mxu1 %v2688_v59  ;;  %1141 = vmatpush.msrb.mxu3 %v2623_v60  ;;  %v2813_v58 = vld [vmem:[%s3264_s7 + $0xdf8] sm:$0xff]  ;;  %v2732_v59 = vld [vmem:[%s3264_s7 + $0xb70] sm:$0xff] }
  0xb7   : > { %1106 = vmatpush.msra.mxu0 %v2655_v61  ;;  %1092 = vmatpush.msrb.mxu2 %v2589_v62  ;;  %v2780_v60 = vld [vmem:[%s3264_s7 + $0xcf0] sm:$0xff]  ;;  %v2644_v61 = vld [vmem:[%s3264_s7 + $0x8e0] sm:$0xff] }
  0xb8   : > { %1132 = vmatpush.msrb.mxu1 %v2685_v63  ;;  %1142 = vmatpush.msrb.mxu3 %v2620_v1  ;;  %v2810_v62 = vld [vmem:[%s3264_s7 + $0xde0] sm:$0xff]  ;;  %v2729_v63 = vld [vmem:[%s3264_s7 + $0xb58] sm:$0xff] }
  0xb9   : > { %1033 = vmatmul.f32.vlgmr.msra.gmra.mxu1 %v3579_v28  ;;  %1107 = vmatpush.msra.mxu0 %v2652_v2  ;;  %v2777_v1 = vld [vmem:[%s3264_s7 + $0xcd8] sm:$0xff]  ;;  %v3695_v2 = vld.sshfl [vmem:[#allocation1] sm:$0xff pattern:$0x73625140] }
  0xba   : > { %1157 = vmatpush.msra.mxu1 %v2683_v3  ;;  %2706 = vmatpush.msk.msra.mxu2 %vm340_vm0, %v2701_v7  ;;  %v3698_v7 = vld.sshfl [vmem:[#allocation1 + $0x8] sm:$0xff pattern:$0x73625140] }
  0xbb   : > { %1143 = vmatpush.msrb.mxu3 %v2617_v8  ;;  %1108 = vmatpush.msra.mxu0 %v2649_v9  ;;  %v3700_v8 = vld.sshfl [vmem:[#allocation1 + $0x10] sm:$0xff pattern:$0x73625140] }
  0xbc   : > { %1158 = vmatpush.msra.mxu1 %v2680_v19  ;;  %1188 = vmatpush.msra.mxu2 %v2698_v10  ;;  %v2641_v10 = vld [vmem:[%s3264_s7 + $0x8c8] sm:$0xff]  ;;  %1660 = vst [vmem:[#allocation1] ss:$4 sm:$0xff] %v3258_v0 }
  0xbd   : > { %1144 = vmatpush.msrb.mxu3 %v2614_v11  ;;  %1109 = vmatpush.msra.mxu0 %v2646_v12  ;;  %v2807_v11 = vld [vmem:[%s3264_s7 + $0xdc8] sm:$0xff]  ;;  %v2774_v12 = vld [vmem:[%s3264_s7 + $0xcc0] sm:$0xff] }
  0xbe   : > { %1159 = vmatpush.msra.mxu1 %v2677_v13  ;;  %1189 = vmatpush.msra.mxu2 %v2695_v20  ;;  %v2638_v13 = vld [vmem:[%s3264_s7 + $0x8b0] sm:$0xff] }
  0xbf   : > { %2703 = vmatmul.msk.f32.vlgmr.msrb.gmra.mxu0 %vm337_vm1, %v3581_v29  ;;  %1145 = vmatpush.msrb.mxu3 %v2611_v14  ;;  %v3672_v45 = vpop.f32.mrf.mxu2  ;;  %v2804_v20 = vld [vmem:[%s3264_s7 + $0xdb0] sm:$0xff] }
  0xc0   : > { %1110 = vmatpush.msra.mxu0 %v2643_v15  ;;  %1160 = vmatpush.msra.mxu1 %v2674_v16  ;;  %v2723_v16 = vld [vmem:[%s3264_s7 + $0xb28] sm:$0xff] }
  0xc1   : > { %1190 = vmatpush.msra.mxu2 %v2692_v17  ;;  %1146 = vmatpush.msrb.mxu3 %v2608_v21  ;;  %v3680_v52 = vpop.f32.mrf.mxu0  ;;  %v2754_v17 = vld [vmem:[%s3264_s7 + $0xc20] sm:$0xff] }
  0xc2   : > { %1093 = vmatmul.f32.vlgmr.msrb.gmra.mxu2 %v3579_v28  ;;  %1111 = vmatpush.msra.mxu0 %v2640_v6  ;;  %v2802_v21 = vld [vmem:[%s3264_s7 + $0xda0] sm:$0xff]  ;;  %v2720_v6 = vld [vmem:[%s3264_s7 + $0xb10] sm:$0xff] }
  0xc3   : > { %1161 = vmatpush.msra.mxu1 %v2671_v22  ;;  %1191 = vmatpush.msra.mxu2 %v2689_v23  ;;  %v2768_v22 = vld [vmem:[%s3264_s7 + $0xc90] sm:$0xff]  ;;  %v2751_v23 = vld [vmem:[%s3264_s7 + $0xc08] sm:$0xff] }
  0xc4   : > { %1053 = vmatmul.f32.vlgmr.msra.gmra.mxu3 %v3583_v30  ;;  %1112 = vmatpush.msra.mxu0 %v2637_v24 }
  0xc5   : > { %1147 = vmatpush.msrb.mxu3 %v2605_v18  ;;  %1162 = vmatpush.msra.mxu1 %v2668_v25  ;;  %v2799_v18 = vld [vmem:[%s3264_s7 + $0xd88] sm:$0xff]  ;;  %v2717_v25 = vld [vmem:[%s3264_s7 + $0xaf8] sm:$0xff] }
  0xc6   : > { %1192 = vmatpush.msra.mxu2 %v2686_v26  ;;  %1347 = vmatpush.msrb.mxu0 %v2753_v27  ;;  %v2765_v27 = vld [vmem:[%s3264_s7 + $0xc78] sm:$0xff] }
  0xc7   : > { %1148 = vmatpush.msrb.mxu3 %v2602_v31  ;;  %1163 = vmatpush.msra.mxu1 %v2665_v33  ;;  %v387_v9 = vpop.f32.mrf.mxu1  ;;  %v2748_v31 = vld [vmem:[%s3264_s7 + $0xbf0] sm:$0xff] }
  0xc8   : > { %1367 = vmatpush.msrb.mxu2 %v2801_v32  ;;  %1113 = vmatmul.f32.vlgmr.msra.gmra.mxu0 %v3583_v30  ;;  %v427_v3 = vpop.f32.mrf.mxu3  ;;  %v447_v19 = vpop.f32.mrf.mxu2  ;;  %v2796_v33 = vld [vmem:[%s3264_s7 + $0xd70] sm:$0xff] }
  0xc9   : > { %1149 = vmatpush.msrb.mxu3 %v2599_v5  ;;  %1348 = vmatpush.msrb.mxu0 %v2750_v34  ;;  %v448_v14 = vadd.f32 %v447_v19, %v427_v3  ;;  %v2714_v5 = vld [vmem:[%s3264_s7 + $0xae0] sm:$0xff] }
  0xca   : > { %1368 = vmatpush.msrb.mxu2 %v2798_v35  ;;  %1164 = vmatpush.msra.mxu1 %v2662_v36  ;;  %v2762_v35 = vld [vmem:[%s3264_s7 + $0xc60] sm:$0xff]  ;;  %v2745_v36 = vld [vmem:[%s3264_s7 + $0xbd8] sm:$0xff] }
  0xcb   : > { %2705 = vmatmul.msk.f32.vlgmr.msrb.gmra.mxu1 %vm337_vm1, %v3581_v29  ;;  %1150 = vmatpush.msrb.mxu3 %v2596_v37  ;;  %v467_v15 = vpop.f32.mrf.mxu0  ;;  %v546_v37 = vlaneseq  ;;  %v2814_v3 = vld [vmem:[%s3264_s7 + $0xe00] sm:$0xff] }
  0xcc   : > { %1349 = vmatpush.msrb.mxu0 %v2747_v38  ;;  %1369 = vmatpush.msrb.mxu2 %v2795_v4  ;;  %v468_v24 = vadd.f32 %v467_v15, %v448_v14  ;;  %v2793_v4 = vld [vmem:[%s3264_s7 + $0xd58] sm:$0xff]  ;;  %v2730_v19 = vld [vmem:[%s3264_s7 + $0xb60] sm:$0xff]  ;;  %v2743_v14 = vld [vmem:[%s3264_s7 + $0xbc8] sm:$0xff] }
  0xcd   : > { %1165 = vmatpush.msra.mxu1 %v2659_v39  ;;  %1151 = vmatpush.msrb.mxu3 %v2593_v40  ;;  %v2711_v39 = vld [vmem:[%s3264_s7 + $0xac8] sm:$0xff]  ;;  %vm3738_vm6 = vcmp.lt.s32.totalorder %v546_v37, 300  ;;  %v2724_v15 = vld [vmem:[%s3264_s7 + $0xb30] sm:$0xff] }
  0xce   : > { %1350 = vmatpush.msrb.mxu0 %v2744_v41  ;;  %1370 = vmatpush.msrb.mxu2 %v2792_v42  ;;  %v533_v38 = vrot.slane %v468_v24, 7  ;;  %v2759_v41 = vld [vmem:[%s3264_s7 + $0xc48] sm:$0xff]  ;;  %v2742_v42 = vld [vmem:[%s3264_s7 + $0xbc0] sm:$0xff] }
  0xcf   : > { %1166 = vmatpush.msra.mxu1 %v2656_v43  ;;  %1152 = vmatpush.msrb.mxu3 %v2590_v44  ;;  %v2718_v24 = vld [vmem:[%s3264_s7 + $0xb00] sm:$0xff] }
  0xd0   : > { %1351 = vmatpush.msrb.mxu0 %v2741_v46  ;;  %1371 = vmatpush.msrb.mxu2 %v2789_v47  ;;  %v2790_v46 = vld [vmem:[%s3264_s7 + $0xd40] sm:$0xff]  ;;  %v2708_v47 = vld [vmem:[%s3264_s7 + $0xab0] sm:$0xff] }
  0xd1   : > { %1167 = vmatpush.msra.mxu1 %v2653_v48  ;;  %2822 = vmatpush.msk.msra.mxu3 %vm340_vm0, %v2819_v49  ;;  %v2756_v48 = vld [vmem:[%s3264_s7 + $0xc30] sm:$0xff]  ;;  %v2739_v49 = vld [vmem:[%s3264_s7 + $0xba8] sm:$0xff] }
  0xd2   : > { %1352 = vmatpush.msrb.mxu0 %v2738_v50  ;;  %1372 = vmatpush.msrb.mxu2 %v2786_v51 }
  0xd3   : > { %1168 = vmatpush.msra.mxu1 %v2650_v53  ;;  %1398 = vmatpush.msra.mxu3 %v2816_v54  ;;  %v2787_v53 = vld [vmem:[%s3264_s7 + $0xd28] sm:$0xff]  ;;  %v2820_v54 = vld [vmem:[%s3264_s7 + $0xe30] sm:$0xf] }
  0xd4   : > { %1353 = vmatpush.msrb.mxu0 %v2735_v55  ;;  %1373 = vmatpush.msrb.mxu2 %v2783_v56  ;;  %v2755_v55 = vld [vmem:[%s3264_s7 + $0xc28] sm:$0xff]  ;;  %v2736_v56 = vld [vmem:[%s3264_s7 + $0xb90] sm:$0xff] }
  0xd5   : > { %1169 = vmatpush.msra.mxu1 %v2647_v57  ;;  %1399 = vmatpush.msra.mxu3 %v2813_v58 }
  0xd6   : > { %1153 = vmatmul.f32.vlgmr.msrb.gmra.mxu3 %v3579_v28  ;;  %1354 = vmatpush.msrb.mxu0 %v2732_v59  ;;  %v2726_v28 = vld [vmem:[%s3264_s7 + $0xb40] sm:$0xff]  ;;  %v2784_v59 = vld [vmem:[%s3264_s7 + $0xd10] sm:$0xff] }
  0xd7   : > { %1374 = vmatpush.msrb.mxu2 %v2780_v60  ;;  %1170 = vmatpush.msra.mxu1 %v2644_v61  ;;  %v2817_v60 = vld [vmem:[%s3264_s7 + $0xe18] sm:$0xff] }
  0xd8   : > { %1400 = vmatpush.msra.mxu3 %v2810_v62  ;;  %2707 = vmatmul.msk.f32.vlgmr.msra.gmra.mxu2 %vm337_vm1, %v3581_v29  ;;  %v2771_v29 = vld [vmem:[%s3264_s7 + $0xca8] sm:$0xff]  ;;  %v2752_v62 = vld [vmem:[%s3264_s7 + $0xc10] sm:$0xff] }
  0xd9   : > { %1355 = vmatpush.msrb.mxu0 %v2729_v63  ;;  %1375 = vmatpush.msrb.mxu2 %v2777_v1  ;;  %v2733_v63 = vld [vmem:[%s3264_s7 + $0xb78] sm:$0xff] }
  0xda   : > { %1171 = vmatpush.msra.mxu1 %v2641_v10  ;;  %1401 = vmatpush.msra.mxu3 %v2807_v11  ;;  %v2781_v1 = vld [vmem:[%s3264_s7 + $0xcf8] sm:$0xff]  ;;  %v2778_v10 = vld [vmem:[%s3264_s7 + $0xce0] sm:$0xff]  ;;  %v2811_v11 = vld [vmem:[%s3264_s7 + $0xde8] sm:$0xff] }
  0xdb   : > { %1356 = vmatpush.msrb.mxu0 %v2726_v28  ;;  %1376 = vmatpush.msrb.mxu2 %v2774_v12  ;;  %v2746_v28 = vld [vmem:[%s3264_s7 + $0xbe0] sm:$0xff]  ;;  %v2727_v12 = vld [vmem:[%s3264_s7 + $0xb48] sm:$0xff] }
  0xdc   : > { %1172 = vmatpush.msra.mxu1 %v2638_v13  ;;  %1402 = vmatpush.msra.mxu3 %v2804_v20  ;;  %v2775_v13 = vld [vmem:[%s3264_s7 + $0xcc8] sm:$0xff]  ;;  %v2808_v20 = vld [vmem:[%s3264_s7 + $0xdd0] sm:$0xff] }
  0xdd   : > { %1173 = vmatmul.f32.vlgmr.msra.gmra.mxu1 %v3583_v30  ;;  %1357 = vmatpush.msrb.mxu0 %v2723_v16  ;;  %v388_v30 = vadd.f32 %v387_v9, %v3680_v52  ;;  %v2749_v9 = vld [vmem:[%s3264_s7 + $0xbf8] sm:$0xff]  ;;  %v2772_v16 = vld [vmem:[%s3264_s7 + $0xcb0] sm:$0xff] }
  0xde   : > { %1377 = vmatpush.msrb.mxu2 %v2771_v29  ;;  %1407 = vmatpush.msrb.mxu1 %v2754_v17  ;;  %v507_v26 = vpop.f32.mrf.mxu3  ;;  %v2805_v29 = vld [vmem:[%s3264_s7 + $0xdb8] sm:$0xff]  ;;  %v2740_v17 = vld [vmem:[%s3264_s7 + $0xbb0] sm:$0xff] }
  0xdf   : > { %1427 = vmatpush.msrb.mxu3 %v2802_v21  ;;  %1358 = vmatpush.msrb.mxu0 %v2720_v6  ;;  %v487_v32 = vpop.f32.mrf.mxu1  ;;  %v408_v44 = vadd.f32 %v3672_v45, %v388_v30  ;;  %v2721_v21 = vld [vmem:[%s3264_s7 + $0xb18] sm:$0xff]  ;;  %v2731_v30 = vld [vmem:[%s3264_s7 + $0xb68] sm:$0xff] }
  0xe0   : > { %1378 = vmatpush.msrb.mxu2 %v2768_v22  ;;  %1408 = vmatpush.msrb.mxu1 %v2751_v23  ;;  %v508_v34 = vadd.f32 %v507_v26, %v487_v32  ;;  %v2769_v6 = vld [vmem:[%s3264_s7 + $0xc98] sm:$0xff]  ;;  %v2803_v22 = vld [vmem:[%s3264_s7 + $0xda8] sm:$0xff]  ;;  %v2734_v26 = vld [vmem:[%s3264_s7 + $0xb80] sm:$0xff] }
  0xe1   : > { %1428 = vmatpush.msrb.mxu3 %v2799_v18  ;;  %1359 = vmatpush.msrb.mxu0 %v2717_v25  ;;  %v536_v45 = vsel %vm535_vm2, %v408_v44, %v533_v38  ;;  %v540_v52 = vsel %vm539_vm3, %v408_v44, %v533_v38  ;;  %v2737_v23 = vld [vmem:[%s3264_s7 + $0xb98] sm:$0xff]  ;;  %v2766_v18 = vld [vmem:[%s3264_s7 + $0xc80] sm:$0xff]  ;;  %v2800_v25 = vld [vmem:[%s3264_s7 + $0xd90] sm:$0xff] }
  0xe2   : > { %1379 = vmatpush.msrb.mxu2 %v2765_v27  ;;  %1409 = vmatpush.msrb.mxu1 %v2748_v31  ;;  %v527_v40 = vpop.f32.mrf.mxu0  ;;  %v2715_v27 = vld [vmem:[%s3264_s7 + $0xae8] sm:$0xff]  ;;  %v2797_v32 = vld [vmem:[%s3264_s7 + $0xd78] sm:$0xff]  ;;  %v2818_v44 = vld [vmem:[%s3264_s7 + $0xe20] sm:$0xff] }
  0xe3   : > { %1429 = vmatpush.msrb.mxu3 %v2796_v33  ;;  %1360 = vmatpush.msrb.mxu0 %v2714_v5  ;;  %v528_v43 = vadd.f32 %v527_v40, %v508_v34  ;;  %v2763_v31 = vld [vmem:[%s3264_s7 + $0xc68] sm:$0xff]  ;;  %v2712_v33 = vld [vmem:[%s3264_s7 + $0xad0] sm:$0xff]  ;;  %v2794_v34 = vld [vmem:[%s3264_s7 + $0xd60] sm:$0xff] }
  0xe4   : > { %1380 = vmatpush.msrb.mxu2 %v2762_v35  ;;  %1410 = vmatpush.msrb.mxu1 %v2745_v36  ;;  %v2760_v5 = vld [vmem:[%s3264_s7 + $0xc50] sm:$0xff]  ;;  %v2709_v36 = vld [vmem:[%s3264_s7 + $0xab8] sm:$0xff] }
  0xe5   : > { %1430 = vmatpush.msrb.mxu3 %v2793_v4  ;;  %1361 = vmatpush.msrb.mxu0 %v2711_v39  ;;  %v534_v50 = vrot.slane %v528_v43, 6  ;;  %v2728_v35 = vld [vmem:[%s3264_s7 + $0xb50] sm:$0xff]  ;;  %v2757_v38 = vld [vmem:[%s3264_s7 + $0xc38] sm:$0xff]  ;;  %v2791_v4 = vld [vmem:[%s3264_s7 + $0xd48] sm:$0xff] }
  0xe6   : > { %1381 = vmatpush.msrb.mxu2 %v2759_v41  ;;  %1411 = vmatpush.msrb.mxu1 %v2742_v42  ;;  %v2725_v39 = vld [vmem:[%s3264_s7 + $0xb38] sm:$0xff]  ;;  %v2873_v41 = vld [vmem:[%s3264_s7 + $0xfa8] sm:$0xff]  ;;  %v2788_v42 = vld [vmem:[%s3264_s7 + $0xd30] sm:$0xff] }
  0xe7   : > { %1431 = vmatpush.msrb.mxu3 %v2790_v46  ;;  %1362 = vmatpush.msrb.mxu0 %v2708_v47  ;;  %v538_v57 = vsel %vm537_vm4, %v536_v45, %v534_v50  ;;  %v542_v58 = vsel %vm541_vm5, %v540_v52, %v534_v50  ;;  %v2821_v40 = vld [vmem:[%s3264_s7 + $0xe38] sm:$0xf]  ;;  %v2722_v43 = vld [vmem:[%s3264_s7 + $0xb20] sm:$0xff]  ;;  %v2870_v46 = vld [vmem:[%s3264_s7 + $0xf90] sm:$0xff] }
  0xe8   : > { %1382 = vmatpush.msrb.mxu2 %v2756_v48  ;;  %1412 = vmatpush.msrb.mxu1 %v2739_v49  ;;  %v543_v61 = vrot.slane %v542_v58, 1  ;;  %550 = vst.msk [vmem:[#allocation2] ss:$8 sm:$0x7] %vm3738_vm6, %v538_v57  ;;  %v2785_v47 = vld [vmem:[%s3264_s7 + $0xd18] sm:$0xff]  ;;  %v2719_v48 = vld [vmem:[%s3264_s7 + $0xb08] sm:$0xff] }
  0xe9   : > { %1432 = vmatpush.msrb.mxu3 %v2787_v53  ;;  %2824 = vmatpush.msk.msra.mxu0 %vm340_vm0, %v2820_v54  ;;  %v2815_v49 = vld [vmem:[%s3264_s7 + $0xe08] sm:$0xff]  ;;  %v2867_v50 = vld [vmem:[%s3264_s7 + $0xf78] sm:$0xff]  ;;  %v2782_v45 = vld [vmem:[%s3264_s7 + $0xd00] sm:$0xff] }
  0xea   : > { %1467 = vmatpush.msra.mxu2 %v2755_v55  ;;  %1413 = vmatpush.msrb.mxu1 %v2736_v56  ;;  %553 = vst.msk [vmem:[#allocation2 + $0x18] ss:$8 sm:$0x7] %vm3738_vm6, %v543_v61  ;;  %v2716_v52 = vld [vmem:[%s3264_s7 + $0xaf0] sm:$0xff]  ;;  %v2864_v54 = vld [vmem:[%s3264_s7 + $0xf60] sm:$0xff]  ;;  %v2779_v55 = vld [vmem:[%s3264_s7 + $0xce8] sm:$0xff] }
  0xeb   : > { %1433 = vmatpush.msrb.mxu3 %v2784_v59  ;;  %1458 = vmatpush.msra.mxu0 %v2817_v60  ;;  %v2812_v53 = vld [vmem:[%s3264_s7 + $0xdf0] sm:$0xff]  ;;  %v2713_v56 = vld [vmem:[%s3264_s7 + $0xad8] sm:$0xff]  ;;  %v2861_v58 = vld [vmem:[%s3264_s7 + $0xf48] sm:$0xff] }
  0xec   : > { %1468 = vmatpush.msra.mxu2 %v2752_v62  ;;  %1414 = vmatpush.msrb.mxu1 %v2733_v63  ;;  %v2809_v57 = vld [vmem:[%s3264_s7 + $0xdd8] sm:$0xff]  ;;  %v2776_v59 = vld [vmem:[%s3264_s7 + $0xcd0] sm:$0xff]  ;;  %v2710_v60 = vld [vmem:[%s3264_s7 + $0xac0] sm:$0xff] }
  0xed   : > { %1434 = vmatpush.msrb.mxu3 %v2781_v1  ;;  %1459 = vmatpush.msra.mxu0 %v2814_v3  ;;  %v2806_v61 = vld [vmem:[%s3264_s7 + $0xdc0] sm:$0xff]  ;;  %v2858_v62 = vld [vmem:[%s3264_s7 + $0xf30] sm:$0xff]  ;;  %v2773_v63 = vld [vmem:[%s3264_s7 + $0xcb8] sm:$0xff] }
  0xee   : > { %1469 = vmatpush.msra.mxu2 %v2749_v9  ;;  %1415 = vmatpush.msrb.mxu1 %v2730_v19  ;;  %v2921_v9 = vld [vmem:[%s3264_s7 + $0x1128] sm:$0xff]  ;;  %v2939_v19 = vld [vmem:[%s3264_s7 + $0x11b8] sm:$0xf] }
  0xef   : > { %1435 = vmatpush.msrb.mxu3 %v2778_v10  ;;  %1460 = vmatpush.msra.mxu0 %v2811_v11  ;;  %v2855_v10 = vld [vmem:[%s3264_s7 + $0xf18] sm:$0xff]  ;;  %v2770_v11 = vld [vmem:[%s3264_s7 + $0xca0] sm:$0xff] }
  0xf0   : > { %1470 = vmatpush.msra.mxu2 %v2746_v28  ;;  %1416 = vmatpush.msrb.mxu1 %v2727_v12  ;;  %v2918_v28 = vld [vmem:[%s3264_s7 + $0x1110] sm:$0xff]  ;;  %v2936_v12 = vld [vmem:[%s3264_s7 + $0x11a0] sm:$0xff] }
  0xf1   : > { %1436 = vmatpush.msrb.mxu3 %v2775_v13  ;;  %1461 = vmatpush.msra.mxu0 %v2808_v20  ;;  %v2852_v13 = vld [vmem:[%s3264_s7 + $0xf00] sm:$0xff]  ;;  %v2767_v20 = vld [vmem:[%s3264_s7 + $0xc88] sm:$0xff] }
  0xf2   : > { %1471 = vmatpush.msra.mxu2 %v2743_v14  ;;  %1417 = vmatpush.msrb.mxu1 %v2724_v15  ;;  %v2915_v14 = vld [vmem:[%s3264_s7 + $0x10f8] sm:$0xff]  ;;  %v2933_v15 = vld [vmem:[%s3264_s7 + $0x1188] sm:$0xff] }
  0xf3   : > { %1437 = vmatpush.msrb.mxu3 %v2772_v16  ;;  %1462 = vmatpush.msra.mxu0 %v2805_v29  ;;  %v2849_v16 = vld [vmem:[%s3264_s7 + $0xee8] sm:$0xff]  ;;  %v2764_v29 = vld [vmem:[%s3264_s7 + $0xc70] sm:$0xff] }
  0xf4   : > { %1472 = vmatpush.msra.mxu2 %v2740_v17  ;;  %1363 = vmatmul.f32.vlgmr.msrb.gmra.mxu0 %v3695_v2  ;;  %v2912_v17 = vld [vmem:[%s3264_s7 + $0x10e0] sm:$0xff] }
  0xf5   : > { %1383 = vmatmul.f32.vlgmr.msrb.gmra.mxu2 %v3698_v7  ;;  %1418 = vmatpush.msrb.mxu1 %v2721_v21  ;;  %v2930_v21 = vld [vmem:[%s3264_s7 + $0x1170] sm:$0xff] }
  0xf6   : > { %1438 = vmatpush.msrb.mxu3 %v2769_v6  ;;  %1487 = vmatpush.msrb.mxu0 %v2803_v22  ;;  %v2846_v6 = vld [vmem:[%s3264_s7 + $0xed0] sm:$0xff] }
  0xf7   : > { %2823 = vmatmul.msk.f32.vlgmr.msra.gmra.mxu3 %vm337_vm1, %v3700_v8  ;;  %1473 = vmatpush.msra.mxu2 %v2737_v23  ;;  %v3826_v1 = vpop.f32.mrf.mxu2  ;;  %v2761_v23 = vld [vmem:[%s3264_s7 + $0xc58] sm:$0xff] }
  0xf8   : > { %1419 = vmatpush.msrb.mxu1 %v2718_v24  ;;  %1439 = vmatpush.msrb.mxu3 %v2766_v18  ;;  %v2909_v24 = vld [vmem:[%s3264_s7 + $0x10c8] sm:$0xff] }
  0xf9   : > { %1488 = vmatpush.msrb.mxu0 %v2800_v25  ;;  %1474 = vmatpush.msra.mxu2 %v2734_v26  ;;  %v724_v26 = vpop.f32.mrf.mxu0 }
  0xfa   : > { %1420 = vmatpush.msrb.mxu1 %v2715_v27  ;;  %1440 = vmatpush.msrb.mxu3 %v2763_v31  ;;  %v3828_v3 = vpop.f32.mrf.mxu1  ;;  %v2927_v27 = vld [vmem:[%s3264_s7 + $0x1158] sm:$0xff] }
  0xfb   : > { %1489 = vmatpush.msrb.mxu0 %v2797_v32  ;;  %1475 = vmatpush.msra.mxu2 %v2731_v30  ;;  %v2843_v31 = vld [vmem:[%s3264_s7 + $0xeb8] sm:$0xff]  ;;  %v2758_v32 = vld [vmem:[%s3264_s7 + $0xc40] sm:$0xff] }
  0xfc   : > { %1421 = vmatpush.msrb.mxu1 %v2712_v33  ;;  %1441 = vmatpush.msrb.mxu3 %v2760_v5  ;;  %v2924_v33 = vld [vmem:[%s3264_s7 + $0x1140] sm:$0xff] }
  0xfd   : > { %1490 = vmatpush.msrb.mxu0 %v2794_v34  ;;  %1476 = vmatpush.msra.mxu2 %v2728_v35  ;;  %v2840_v5 = vld [vmem:[%s3264_s7 + $0xea0] sm:$0xff]  ;;  %v2922_v34 = vld [vmem:[%s3264_s7 + $0x1130] sm:$0xff]  ;;  %v2903_v35 = vld [vmem:[%s3264_s7 + $0x1098] sm:$0xff] }
  0xfe   : > { %1422 = vmatpush.msrb.mxu1 %v2709_v36  ;;  %1442 = vmatpush.msrb.mxu3 %v2757_v38  ;;  %v2837_v36 = vld [vmem:[%s3264_s7 + $0xe88] sm:$0xff]  ;;  %v2874_v38 = vld [vmem:[%s3264_s7 + $0xfb0] sm:$0xff] }
  0xff   : > { %1491 = vmatpush.msrb.mxu0 %v2791_v4  ;;  %1443 = vmatmul.f32.vlgmr.msrb.gmra.mxu3 %v3698_v7  ;;  %v2919_v4 = vld [vmem:[%s3264_s7 + $0x1118] sm:$0xff] }
 0x100   : > { %1477 = vmatpush.msra.mxu2 %v2725_v39  ;;  %2826 = vmatpush.msk.msra.mxu1 %vm340_vm0, %v2821_v40  ;;  %v2900_v39 = vld [vmem:[%s3264_s7 + $0x1080] sm:$0xff] }
 0x101   : > { %1677 = vmatpush.msra.mxu3 %v2873_v41  ;;  %1492 = vmatpush.msrb.mxu0 %v2788_v42  ;;  %v3862_v40 = vld.sshfl [vmem:[#allocation1] sm:$0xff pattern:$0x73625140]  ;;  %v3864_v42 = vld.sshfl [vmem:[#allocation1 + $0x10] sm:$0xff pattern:$0x73625140] }
 0x102   : > { %1478 = vmatpush.msra.mxu2 %v2722_v43  ;;  %1518 = vmatpush.msra.mxu1 %v2818_v44  ;;  %v3866_v43 = vld.sshfl [vmem:[#allocation1 + $0x8] sm:$0xff pattern:$0x73625140]  ;;  %v2834_v44 = vld [vmem:[%s3264_s7 + $0xe70] sm:$0xff] }
 0x103   : > { %1678 = vmatpush.msra.mxu3 %v2870_v46  ;;  %1493 = vmatpush.msrb.mxu0 %v2785_v47  ;;  %v2871_v46 = vld [vmem:[%s3264_s7 + $0xf98] sm:$0xff]  ;;  %1990 = vst [vmem:[#allocation1] ss:$4 sm:$0xff] %v3258_v0  ;;  %v725_v47 = vadd.f32 %v724_v26, %v3826_v1  ;;  %v2913_v0 = vld [vmem:[%s3264_s7 + $0x10e8] sm:$0xff] }
 0x104   : > { %1479 = vmatpush.msra.mxu2 %v2719_v48  ;;  %1519 = vmatpush.msra.mxu1 %v2815_v49  ;;  %v2916_v48 = vld [vmem:[%s3264_s7 + $0x1100] sm:$0xff]  ;;  %v2897_v49 = vld [vmem:[%s3264_s7 + $0x1068] sm:$0xff]  ;;  %v2895_v26 = vld [vmem:[%s3264_s7 + $0x1058] sm:$0xff] }
 0x105   : > { %1679 = vmatpush.msra.mxu3 %v2867_v50  ;;  %1494 = vmatpush.msrb.mxu0 %v2782_v45  ;;  %v2831_v45 = vld [vmem:[%s3264_s7 + $0xe58] sm:$0xff] }
 0x106   : > { %1423 = vmatmul.f32.vlgmr.msrb.gmra.mxu1 %v3695_v2  ;;  %1480 = vmatpush.msra.mxu2 %v2716_v52  ;;  %v2868_v52 = vld [vmem:[%s3264_s7 + $0xf80] sm:$0xff] }
 0x107   : > { %1520 = vmatpush.msra.mxu1 %v2812_v53  ;;  %1680 = vmatpush.msra.mxu3 %v2864_v54  ;;  %v764_v22 = vpop.f32.mrf.mxu3 }
 0x108   : > { %1495 = vmatpush.msrb.mxu0 %v2779_v55  ;;  %1481 = vmatpush.msra.mxu2 %v2713_v56  ;;  %v784_v18 = vpop.f32.mrf.mxu1  ;;  %v2894_v55 = vld [vmem:[%s3264_s7 + $0x1050] sm:$0xff]  ;;  %v2828_v56 = vld [vmem:[%s3264_s7 + $0xe40] sm:$0xff] }
 0x109   : > { %2825 = vmatmul.msk.f32.vlgmr.msra.gmra.mxu0 %vm337_vm1, %v3700_v8  ;;  %1521 = vmatpush.msra.mxu1 %v2809_v57  ;;  %v804_v25 = vpop.f32.mrf.mxu2  ;;  %v785_v30 = vadd.f32 %v784_v18, %v764_v22  ;;  %v2865_v57 = vld [vmem:[%s3264_s7 + $0xf68] sm:$0xff]  ;;  %v2928_v18 = vld [vmem:[%s3264_s7 + $0x1160] sm:$0xff] }
 0x10a   : > { %1681 = vmatpush.msra.mxu3 %v2861_v58  ;;  %1496 = vmatpush.msrb.mxu0 %v2776_v59  ;;  %v745_v59 = vadd.f32 %v3828_v3, %v725_v47  ;;  %v2888_v3 = vld [vmem:[%s3264_s7 + $0x1020] sm:$0xff]  ;;  %v2853_v22 = vld [vmem:[%s3264_s7 + $0xf08] sm:$0xff] }
 0x10b   : > { %1482 = vmatpush.msra.mxu2 %v2710_v60  ;;  %1522 = vmatpush.msra.mxu1 %v2806_v61  ;;  %v805_v41 = vadd.f32 %v804_v25, %v785_v30  ;;  %v2910_v60 = vld [vmem:[%s3264_s7 + $0x10d0] sm:$0xff]  ;;  %v2891_v61 = vld [vmem:[%s3264_s7 + $0x1038] sm:$0xff]  ;;  %v2880_v47 = vld [vmem:[%s3264_s7 + $0xfe0] sm:$0xff] }
 0x10c   : > { %1682 = vmatpush.msra.mxu3 %v2858_v62  ;;  %1497 = vmatpush.msrb.mxu0 %v2773_v63  ;;  %v2940_v62 = vld [vmem:[%s3264_s7 + $0x11c0] sm:$0xf]  ;;  %v2862_v63 = vld [vmem:[%s3264_s7 + $0xf50] sm:$0xff]  ;;  %v2923_v30 = vld [vmem:[%s3264_s7 + $0x1138] sm:$0xff] }
 0x10d   : > { %1697 = vmatpush.msrb.mxu1 %v2921_v9  ;;  %2942 = vmatpush.msk.msrb.mxu2 %vm340_vm0, %v2939_v19  ;;  %v870_v54 = vrot.slane %v805_v41, 7  ;;  %v2850_v25 = vld [vmem:[%s3264_s7 + $0xef0] sm:$0xff]  ;;  %v2883_v41 = vld [vmem:[%s3264_s7 + $0xff8] sm:$0xff] }
 0x10e   : > { %1683 = vmatpush.msra.mxu3 %v2855_v10  ;;  %1498 = vmatpush.msrb.mxu0 %v2770_v11  ;;  %v2907_v10 = vld [vmem:[%s3264_s7 + $0x10b8] sm:$0xff]  ;;  %v2937_v11 = vld [vmem:[%s3264_s7 + $0x11a8] sm:$0xff] }
 0x10f   : > { %1698 = vmatpush.msrb.mxu1 %v2918_v28  ;;  %1728 = vmatpush.msrb.mxu2 %v2936_v12  ;;  %v872_v9 = vsel %vm535_vm2, %v745_v59, %v870_v54  ;;  %v874_v19 = vsel %vm539_vm3, %v745_v59, %v870_v54  ;;  %v2859_v28 = vld [vmem:[%s3264_s7 + $0xf38] sm:$0xff]  ;;  %v2902_v59 = vld [vmem:[%s3264_s7 + $0x1090] sm:$0xff] }
 0x110   : > { %1684 = vmatpush.msra.mxu3 %v2852_v13  ;;  %1499 = vmatpush.msrb.mxu0 %v2767_v20  ;;  %v2904_v20 = vld [vmem:[%s3264_s7 + $0x10a0] sm:$0xff]  ;;  %v2993_v54 = vld [vmem:[%s3264_s7 + $0x1338] sm:$0xff] }
 0x111   : > { %1699 = vmatpush.msrb.mxu1 %v2915_v14  ;;  %1729 = vmatpush.msrb.mxu2 %v2933_v15  ;;  %v2885_v14 = vld [vmem:[%s3264_s7 + $0x1008] sm:$0xff] }
 0x112   : > { %1483 = vmatmul.f32.vlgmr.msra.gmra.mxu2 %v3695_v2  ;;  %1685 = vmatpush.msra.mxu3 %v2849_v16  ;;  %v2906_v2 = vld [vmem:[%s3264_s7 + $0x10b0] sm:$0xff] }
 0x113   : > { %1500 = vmatpush.msrb.mxu0 %v2764_v29  ;;  %1700 = vmatpush.msrb.mxu1 %v2912_v17  ;;  %v2934_v16 = vld [vmem:[%s3264_s7 + $0x1190] sm:$0xff]  ;;  %v2856_v29 = vld [vmem:[%s3264_s7 + $0xf20] sm:$0xff]  ;;  %v2901_v17 = vld [vmem:[%s3264_s7 + $0x1088] sm:$0xff] }
 0x114   : > { %1730 = vmatpush.msrb.mxu2 %v2930_v21  ;;  %1686 = vmatpush.msra.mxu3 %v2846_v6  ;;  %v2882_v21 = vld [vmem:[%s3264_s7 + $0xff0] sm:$0xff]  ;;  %v2931_v6 = vld [vmem:[%s3264_s7 + $0x1178] sm:$0xff] }
 0x115   : > { %1501 = vmatpush.msrb.mxu0 %v2761_v23  ;;  %1701 = vmatpush.msrb.mxu1 %v2909_v24  ;;  %v2898_v23 = vld [vmem:[%s3264_s7 + $0x1070] sm:$0xff]  ;;  %v2879_v24 = vld [vmem:[%s3264_s7 + $0xfd8] sm:$0xff] }
 0x116   : > { %1731 = vmatpush.msrb.mxu2 %v2927_v27  ;;  %1687 = vmatpush.msra.mxu3 %v2843_v31  ;;  %v2876_v27 = vld [vmem:[%s3264_s7 + $0xfc0] sm:$0xff]  ;;  %v2925_v31 = vld [vmem:[%s3264_s7 + $0x1148] sm:$0xff] }
 0x117   : > { %1502 = vmatpush.msrb.mxu0 %v2758_v32  ;;  %1702 = vmatpush.msrb.mxu1 %v2906_v2  ;;  %v2875_v32 = vld [vmem:[%s3264_s7 + $0xfb8] sm:$0xff]  ;;  %v2892_v2 = vld [vmem:[%s3264_s7 + $0x1040] sm:$0xff] }
 0x118   : > { %1732 = vmatpush.msrb.mxu2 %v2924_v33  ;;  %1503 = vmatmul.f32.vlgmr.msrb.gmra.mxu0 %v3698_v7  ;;  %v2872_v33 = vld [vmem:[%s3264_s7 + $0xfa0] sm:$0xff] }
 0x119   : > { %1688 = vmatpush.msra.mxu3 %v2840_v5  ;;  %1703 = vmatpush.msrb.mxu1 %v2903_v35  ;;  %v2889_v5 = vld [vmem:[%s3264_s7 + $0x1028] sm:$0xff]  ;;  %v2920_v35 = vld [vmem:[%s3264_s7 + $0x1120] sm:$0xff] }
 0x11a   : > { %1757 = vmatpush.msra.mxu2 %v2922_v34  ;;  %1737 = vmatpush.msra.mxu0 %v2874_v38  ;;  %v844_v7 = vpop.f32.mrf.mxu2  ;;  %v2847_v34 = vld [vmem:[%s3264_s7 + $0xed8] sm:$0xff]  ;;  %v2869_v38 = vld [vmem:[%s3264_s7 + $0xf88] sm:$0xff] }
 0x11b   : > { %2827 = vmatmul.msk.f32.vlgmr.msra.gmra.mxu1 %vm337_vm1, %v3700_v8  ;;  %1689 = vmatpush.msra.mxu3 %v2837_v36  ;;  %v824_v50 = vpop.f32.mrf.mxu0  ;;  %v2886_v36 = vld [vmem:[%s3264_s7 + $0x1010] sm:$0xff] }
 0x11c   : > { %1758 = vmatpush.msra.mxu2 %v2919_v4  ;;  %1704 = vmatpush.msrb.mxu1 %v2900_v39  ;;  %v845_v53 = vadd.f32 %v844_v7, %v824_v50  ;;  %v2917_v4 = vld [vmem:[%s3264_s7 + $0x1108] sm:$0xff]  ;;  %v2844_v39 = vld [vmem:[%s3264_s7 + $0xec0] sm:$0xff]  ;;  %v2838_v50 = vld [vmem:[%s3264_s7 + $0xe90] sm:$0xff] }
 0x11d   : > { %1690 = vmatpush.msra.mxu3 %v2834_v44  ;;  %1738 = vmatpush.msra.mxu0 %v2871_v46  ;;  %v864_v8 = vpop.f32.mrf.mxu3  ;;  %v2866_v44 = vld [vmem:[%s3264_s7 + $0xf70] sm:$0xff]  ;;  %v2841_v7 = vld [vmem:[%s3264_s7 + $0xea8] sm:$0xff] }
 0x11e   : > { %1759 = vmatpush.msra.mxu2 %v2916_v48  ;;  %1705 = vmatpush.msrb.mxu1 %v2897_v49  ;;  %v865_v58 = vadd.f32 %v864_v8, %v845_v53  ;;  %v2914_v46 = vld [vmem:[%s3264_s7 + $0x10f0] sm:$0xff]  ;;  %v2863_v48 = vld [vmem:[%s3264_s7 + $0xf58] sm:$0xff]  ;;  %v2908_v53 = vld [vmem:[%s3264_s7 + $0x10c0] sm:$0xff] }
 0x11f   : > { %1691 = vmatpush.msra.mxu3 %v2831_v45  ;;  %1739 = vmatpush.msra.mxu0 %v2868_v52  ;;  %v2911_v49 = vld [vmem:[%s3264_s7 + $0x10d8] sm:$0xff]  ;;  %v2877_v45 = vld [vmem:[%s3264_s7 + $0xfc8] sm:$0xff]  ;;  %v2860_v52 = vld [vmem:[%s3264_s7 + $0xf40] sm:$0xff] }
 0x120   : > { %1760 = vmatpush.msra.mxu2 %v2913_v0  ;;  %1706 = vmatpush.msrb.mxu1 %v2894_v55  ;;  %v871_v1 = vrot.slane %v865_v58, 6  ;;  %v2835_v0 = vld [vmem:[%s3264_s7 + $0xe78] sm:$0xff]  ;;  %v2857_v55 = vld [vmem:[%s3264_s7 + $0xf28] sm:$0xff]  ;;  %v2854_v58 = vld [vmem:[%s3264_s7 + $0xf10] sm:$0xff] }
 0x121   : > { %1692 = vmatpush.msra.mxu3 %v2828_v56  ;;  %1740 = vmatpush.msra.mxu0 %v2865_v57  ;;  %v2905_v8 = vld [vmem:[%s3264_s7 + $0x10a8] sm:$0xff]  ;;  %v2990_v56 = vld [vmem:[%s3264_s7 + $0x1320] sm:$0xff] }
 0x122   : > { %1761 = vmatpush.msra.mxu2 %v2910_v60  ;;  %1707 = vmatpush.msrb.mxu1 %v2891_v61  ;;  %v873_v12 = vsel %vm537_vm4, %v872_v9, %v871_v1  ;;  %v875_v13 = vsel %vm541_vm5, %v874_v19, %v871_v1  ;;  %v2832_v57 = vld [vmem:[%s3264_s7 + $0xe60] sm:$0xff]  ;;  %v2987_v60 = vld [vmem:[%s3264_s7 + $0x1308] sm:$0xff]  ;;  %v2984_v1 = vld [vmem:[%s3264_s7 + $0x12f0] sm:$0xff] }
 0x123   : > { %2944 = vmatpush.msk.msrb.mxu3 %vm340_vm0, %v2940_v62  ;;  %1741 = vmatpush.msra.mxu0 %v2862_v63  ;;  %v876_v15 = vrot.slane %v875_v13, 1  ;;  %880 = vst.msk [vmem:[#allocation2 + $0x1] ss:$8 sm:$0x7] %vm3738_vm6, %v873_v12  ;;  %v2829_v61 = vld [vmem:[%s3264_s7 + $0xe48] sm:$0xff]  ;;  %v2851_v62 = vld [vmem:[%s3264_s7 + $0xef8] sm:$0xff] }
 0x124   : > { %1762 = vmatpush.msra.mxu2 %v2907_v10  ;;  %1708 = vmatpush.msrb.mxu1 %v2888_v3  ;;  %v2899_v63 = vld [vmem:[%s3264_s7 + $0x1078] sm:$0xff]  ;;  %v2941_v9 = vld [vmem:[%s3264_s7 + $0x11c8] sm:$0xf]  ;;  %v2848_v19 = vld [vmem:[%s3264_s7 + $0xee0] sm:$0xff] }
 0x125   : > { %1788 = vmatpush.msrb.mxu3 %v2937_v11  ;;  %1742 = vmatpush.msra.mxu0 %v2859_v28  ;;  %883 = vst.msk [vmem:[#allocation2 + $0x19] ss:$8 sm:$0x7] %vm3738_vm6, %v876_v15  ;;  %v2896_v10 = vld [vmem:[%s3264_s7 + $0x1060] sm:$0xff]  ;;  %v2981_v3 = vld [vmem:[%s3264_s7 + $0x12d8] sm:$0xff]  ;;  %v2938_v11 = vld [vmem:[%s3264_s7 + $0x11b0] sm:$0xff] }
 0x126   : > { %1763 = vmatpush.msra.mxu2 %v2904_v20  ;;  %1709 = vmatpush.msrb.mxu1 %v2885_v14  ;;  %v2845_v28 = vld [vmem:[%s3264_s7 + $0xec8] sm:$0xff]  ;;  %v2978_v13 = vld [vmem:[%s3264_s7 + $0x12c0] sm:$0xff]  ;;  %v2935_v20 = vld [vmem:[%s3264_s7 + $0x1198] sm:$0xff] }
 0x127   : > { %1789 = vmatpush.msrb.mxu3 %v2934_v16  ;;  %1743 = vmatpush.msra.mxu0 %v2856_v29  ;;  %v2893_v12 = vld [vmem:[%s3264_s7 + $0x1048] sm:$0xff]  ;;  %v2842_v14 = vld [vmem:[%s3264_s7 + $0xeb0] sm:$0xff]  ;;  %v2932_v29 = vld [vmem:[%s3264_s7 + $0x1180] sm:$0xff] }
 0x128   : > { %1764 = vmatpush.msra.mxu2 %v2901_v17  ;;  %1710 = vmatpush.msrb.mxu1 %v2882_v21  ;;  %v2890_v15 = vld [vmem:[%s3264_s7 + $0x1030] sm:$0xff]  ;;  %v2975_v16 = vld [vmem:[%s3264_s7 + $0x12a8] sm:$0xff]  ;;  %v2839_v17 = vld [vmem:[%s3264_s7 + $0xe98] sm:$0xff] }
 0x129   : > { %1790 = vmatpush.msrb.mxu3 %v2931_v6  ;;  %1744 = vmatpush.msra.mxu0 %v2853_v22  ;;  %v2887_v21 = vld [vmem:[%s3264_s7 + $0x1018] sm:$0xff]  ;;  %v2972_v6 = vld [vmem:[%s3264_s7 + $0x1290] sm:$0xff]  ;;  %v2929_v22 = vld [vmem:[%s3264_s7 + $0x1168] sm:$0xff] }
 0x12a   : > { %1765 = vmatpush.msra.mxu2 %v2898_v23  ;;  %1711 = vmatpush.msrb.mxu1 %v2879_v24  ;;  %v2836_v24 = vld [vmem:[%s3264_s7 + $0xe80] sm:$0xff] }
 0x12b   : > { %1791 = vmatpush.msrb.mxu3 %v2928_v18  ;;  %1745 = vmatpush.msra.mxu0 %v2850_v25  ;;  %v2884_v18 = vld [vmem:[%s3264_s7 + $0x1000] sm:$0xff]  ;;  %v2969_v25 = vld [vmem:[%s3264_s7 + $0x1278] sm:$0xff] }
 0x12c   : > { %1766 = vmatpush.msra.mxu2 %v2895_v26  ;;  %1712 = vmatpush.msrb.mxu1 %v2876_v27  ;;  %v2926_v27 = vld [vmem:[%s3264_s7 + $0x1150] sm:$0xff] }
 0x12d   : > { %1792 = vmatpush.msrb.mxu3 %v2925_v31  ;;  %1746 = vmatpush.msra.mxu0 %v2847_v34  ;;  %v2833_v31 = vld [vmem:[%s3264_s7 + $0xe68] sm:$0xff]  ;;  %v3038_v34 = vld [vmem:[%s3264_s7 + $0x14a0] sm:$0xff] }
 0x12e   : > { %1797 = vmatpush.msra.mxu1 %v2875_v32  ;;  %1693 = vmatmul.f32.vlgmr.msra.gmra.mxu3 %v3862_v40  ;;  %v2881_v32 = vld [vmem:[%s3264_s7 + $0xfe8] sm:$0xff] }
 0x12f   : > { %1767 = vmatpush.msra.mxu2 %v2892_v2  ;;  %1817 = vmatpush.msra.mxu3 %v2923_v30  ;;  %v3041_v2 = vld [vmem:[%s3264_s7 + $0x14b8] sm:$0xff]  ;;  %v2966_v30 = vld [vmem:[%s3264_s7 + $0x1260] sm:$0xff] }
 0x130   : > { %1798 = vmatpush.msra.mxu1 %v2872_v33  ;;  %2943 = vmatmul.msk.f32.vlgmr.msrb.gmra.mxu2 %vm337_vm1, %v3864_v42  ;;  %v2830_v33 = vld [vmem:[%s3264_s7 + $0xe50] sm:$0xff] }
 0x131   : > { %1768 = vmatpush.msra.mxu2 %v2889_v5  ;;  %1818 = vmatpush.msra.mxu3 %v2920_v35  ;;  %v2878_v5 = vld [vmem:[%s3264_s7 + $0xfd0] sm:$0xff]  ;;  %v2963_v35 = vld [vmem:[%s3264_s7 + $0x1248] sm:$0xff] }
 0x132   : > { %1799 = vmatpush.msra.mxu1 %v2869_v38  ;;  %1747 = vmatpush.msra.mxu0 %v2844_v39  ;;  %v3035_v38 = vld [vmem:[%s3264_s7 + $0x1488] sm:$0xff]  ;;  %v2994_v39 = vld [vmem:[%s3264_s7 + $0x1340] sm:$0xff] }
 0x133   : > { %1769 = vmatpush.msra.mxu2 %v2886_v36  ;;  %1819 = vmatpush.msra.mxu3 %v2917_v4  ;;  %v3059_v36 = vld [vmem:[%s3264_s7 + $0x1548] sm:$0xf]  ;;  %v2960_v4 = vld [vmem:[%s3264_s7 + $0x1230] sm:$0xff] }
 0x134   : > { %1800 = vmatpush.msra.mxu1 %v2866_v44  ;;  %1748 = vmatpush.msra.mxu0 %v2841_v7 }
 0x135   : > { %1770 = vmatpush.msra.mxu2 %v2883_v41  ;;  %1820 = vmatpush.msra.mxu3 %v2914_v46  ;;  %v3056_v41 = vld [vmem:[%s3264_s7 + $0x1530] sm:$0xff] }
 0x136   : > { %1801 = vmatpush.msra.mxu1 %v2863_v48  ;;  %1749 = vmatpush.msra.mxu0 %v2838_v50  ;;  %v3981_v26 = vpop.f32.mrf.mxu1  ;;  %v3032_v46 = vld [vmem:[%s3264_s7 + $0x1470] sm:$0xff] }
 0x137   : > { %1771 = vmatpush.msra.mxu2 %v2880_v47  ;;  %1821 = vmatpush.msra.mxu3 %v2911_v49  ;;  %v2957_v47 = vld [vmem:[%s3264_s7 + $0x1218] sm:$0xff] }
 0x138   : > { %1802 = vmatpush.msra.mxu1 %v2860_v52  ;;  %1750 = vmatpush.msra.mxu0 %v2835_v0  ;;  %v3053_v49 = vld [vmem:[%s3264_s7 + $0x1518] sm:$0xff]  ;;  %v2991_v52 = vld [vmem:[%s3264_s7 + $0x1328] sm:$0xff]  ;;  %v3026_v0 = vld [vmem:[%s3264_s7 + $0x1440] sm:$0xff] }
 0x139   : > { %1772 = vmatpush.msra.mxu2 %v2877_v45  ;;  %1822 = vmatpush.msra.mxu3 %v2908_v53  ;;  %v3029_v45 = vld [vmem:[%s3264_s7 + $0x1458] sm:$0xff] }
 0x13a   : > { %1773 = vmatmul.f32.vlgmr.msra.gmra.mxu2 %v3866_v43  ;;  %1803 = vmatpush.msra.mxu1 %v2857_v55  ;;  %v2951_v55 = vld [vmem:[%s3264_s7 + $0x11e8] sm:$0xff] }
 0x13b   : > { %2007 = vmatpush.msrb.mxu2 %v2993_v54  ;;  %1823 = vmatpush.msra.mxu3 %v2905_v8  ;;  %v3050_v54 = vld [vmem:[%s3264_s7 + $0x1500] sm:$0xff]  ;;  %v3047_v8 = vld [vmem:[%s3264_s7 + $0x14e8] sm:$0xff] }
 0x13c   : > { %2945 = vmatmul.msk.f32.vlgmr.msrb.gmra.mxu3 %vm337_vm1, %v3864_v42  ;;  %1751 = vmatpush.msra.mxu0 %v2832_v57  ;;  %v3976_v23 = vpop.f32.mrf.mxu0  ;;  %v2988_v57 = vld [vmem:[%s3264_s7 + $0x1310] sm:$0xff] }
 0x13d   : > { %2008 = vmatpush.msrb.mxu2 %v2990_v56  ;;  %1804 = vmatpush.msra.mxu1 %v2854_v58  ;;  %v3023_v56 = vld [vmem:[%s3264_s7 + $0x1428] sm:$0xff]  ;;  %v2948_v58 = vld [vmem:[%s3264_s7 + $0x11d0] sm:$0xff] }
 0x13e   : > { %1824 = vmatpush.msra.mxu3 %v2902_v59  ;;  %1713 = vmatmul.f32.vlgmr.msrb.gmra.mxu1 %v3866_v43 }
 0x13f   : > { %2009 = vmatpush.msrb.mxu2 %v2987_v60  ;;  %1752 = vmatpush.msra.mxu0 %v2829_v61  ;;  %v3044_v60 = vld [vmem:[%s3264_s7 + $0x14d0] sm:$0xff] }
 0x140   : > { %1805 = vmatpush.msra.mxu1 %v2851_v62  ;;  %1825 = vmatpush.msra.mxu3 %v2899_v63  ;;  %v3020_v61 = vld [vmem:[%s3264_s7 + $0x1410] sm:$0xff]  ;;  %v2985_v62 = vld [vmem:[%s3264_s7 + $0x12f8] sm:$0xff]  ;;  %v3042_v63 = vld [vmem:[%s3264_s7 + $0x14c0] sm:$0xff] }
 0x141   : > { %1753 = vmatmul.f32.vlgmr.msra.gmra.mxu0 %v3862_v40  ;;  %2010 = vmatpush.msrb.mxu2 %v2984_v1 }
 0x142   : > { %2946 = vmatpush.msk.msrb.mxu0 %vm340_vm0, %v2941_v9  ;;  %1806 = vmatpush.msra.mxu1 %v2848_v19  ;;  %v3060_v9 = vld [vmem:[%s3264_s7 + $0x1550] sm:$0xf]  ;;  %v3017_v19 = vld [vmem:[%s3264_s7 + $0x13f8] sm:$0xff] }
 0x143   : > { %1826 = vmatpush.msra.mxu3 %v2896_v10  ;;  %2011 = vmatpush.msrb.mxu2 %v2981_v3  ;;  %v3039_v3 = vld [vmem:[%s3264_s7 + $0x14a8] sm:$0xff] }
 0x144   : > { %1848 = vmatpush.msrb.mxu0 %v2938_v11  ;;  %1807 = vmatpush.msra.mxu1 %v2845_v28 }
 0x145   : > { %1827 = vmatpush.msra.mxu3 %v2893_v12  ;;  %2012 = vmatpush.msrb.mxu2 %v2978_v13  ;;  %v1094_v44 = vpop.f32.mrf.mxu2  ;;  %v1114_v7 = vpop.f32.mrf.mxu0 }
 0x146   : > { %1849 = vmatpush.msrb.mxu0 %v2935_v20  ;;  %1808 = vmatpush.msra.mxu1 %v2842_v14  ;;  %v1115_v53 = vadd.f32 %v1114_v7, %v1094_v44  ;;  %v3057_v20 = vld [vmem:[%s3264_s7 + $0x1538] sm:$0xff]  ;;  %v3014_v14 = vld [vmem:[%s3264_s7 + $0x13e0] sm:$0xff]  ;;  %v3024_v44 = vld [vmem:[%s3264_s7 + $0x1430] sm:$0xff] }
 0x147   : > { %1828 = vmatpush.msra.mxu3 %v2890_v15  ;;  %2013 = vmatpush.msrb.mxu2 %v2975_v16  ;;  %v1054_v48 = vpop.f32.mrf.mxu3  ;;  %v2979_v15 = vld [vmem:[%s3264_s7 + $0x12c8] sm:$0xff]  ;;  %v3036_v16 = vld [vmem:[%s3264_s7 + $0x1490] sm:$0xff] }
 0x148   : > { %1850 = vmatpush.msrb.mxu0 %v2932_v29  ;;  %1809 = vmatpush.msra.mxu1 %v2839_v17  ;;  %v1134_v50 = vpop.f32.mrf.mxu1  ;;  %v3054_v17 = vld [vmem:[%s3264_s7 + $0x1520] sm:$0xff]  ;;  %v2964_v7 = vld [vmem:[%s3264_s7 + $0x1250] sm:$0xff] }
 0x149   : > { %1829 = vmatpush.msra.mxu3 %v2887_v21  ;;  %2014 = vmatpush.msrb.mxu2 %v2972_v6  ;;  %v1135_v59 = vadd.f32 %v1134_v50, %v1115_v53  ;;  %v3011_v21 = vld [vmem:[%s3264_s7 + $0x13c8] sm:$0xff]  ;;  %v2976_v6 = vld [vmem:[%s3264_s7 + $0x12b0] sm:$0xff]  ;;  %v2961_v50 = vld [vmem:[%s3264_s7 + $0x1238] sm:$0xff] }
 0x14a   : > { %1851 = vmatpush.msrb.mxu0 %v2929_v22  ;;  %1810 = vmatpush.msra.mxu1 %v2836_v24  ;;  %v3033_v22 = vld [vmem:[%s3264_s7 + $0x1478] sm:$0xff]  ;;  %v2958_v53 = vld [vmem:[%s3264_s7 + $0x1220] sm:$0xff] }
 0x14b   : > { %1830 = vmatpush.msra.mxu3 %v2884_v18  ;;  %2015 = vmatpush.msrb.mxu2 %v2969_v25  ;;  %v1200_v13 = vrot.slane %v1135_v59, 7  ;;  %v3051_v25 = vld [vmem:[%s3264_s7 + $0x1508] sm:$0xff]  ;;  %v2989_v59 = vld [vmem:[%s3264_s7 + $0x1318] sm:$0xff] }
 0x14c   : > { %1852 = vmatpush.msrb.mxu0 %v2926_v27  ;;  %1811 = vmatpush.msra.mxu1 %v2833_v31  ;;  %v2973_v27 = vld [vmem:[%s3264_s7 + $0x1298] sm:$0xff]  ;;  %v3030_v31 = vld [vmem:[%s3264_s7 + $0x1460] sm:$0xff] }
 0x14d   : > { %1831 = vmatpush.msra.mxu3 %v2881_v32  ;;  %2016 = vmatpush.msrb.mxu2 %v2966_v30  ;;  %v3048_v30 = vld [vmem:[%s3264_s7 + $0x14f0] sm:$0xff] }
 0x14e   : > { %2027 = vmatpush.msra.mxu0 %v3041_v2  ;;  %1812 = vmatpush.msra.mxu1 %v2830_v33  ;;  %v3005_v33 = vld [vmem:[%s3264_s7 + $0x1398] sm:$0xff] }
 0x14f   : > { %1832 = vmatpush.msra.mxu3 %v2878_v5  ;;  %2017 = vmatpush.msrb.mxu2 %v2963_v35  ;;  %v3027_v35 = vld [vmem:[%s3264_s7 + $0x1448] sm:$0xff] }
 0x150   : > { %2028 = vmatpush.msra.mxu0 %v3038_v34  ;;  %1833 = vmatmul.f32.vlgmr.msra.gmra.mxu3 %v3866_v43  ;;  %v2954_v43 = vld [vmem:[%s3264_s7 + $0x1200] sm:$0xff] }
 0x151   : > { %3062 = vmatpush.msk.msrb.mxu1 %vm340_vm0, %v3059_v36  ;;  %2018 = vmatpush.msrb.mxu2 %v2960_v4  ;;  %v2970_v34 = vld [vmem:[%s3264_s7 + $0x1280] sm:$0xff]  ;;  %v3045_v36 = vld [vmem:[%s3264_s7 + $0x14d8] sm:$0xff] }
 0x152   : > { %2029 = vmatpush.msra.mxu0 %v3035_v38  ;;  %2067 = vmatpush.msrb.mxu3 %v2994_v39  ;;  %v3002_v38 = vld [vmem:[%s3264_s7 + $0x1380] sm:$0xff]  ;;  %v2967_v39 = vld [vmem:[%s3264_s7 + $0x1268] sm:$0xff] }
 0x153   : > { %2058 = vmatpush.msrb.mxu1 %v3056_v41  ;;  %2019 = vmatpush.msrb.mxu2 %v2957_v47  ;;  %v4052_v4 = vld.sshfl [vmem:[#allocation1] sm:$0xff pattern:$0x73625140]  ;;  %v3043_v41 = vld [vmem:[%s3264_s7 + $0x14c8] sm:$0xff]  ;;  %v3040_v47 = vld [vmem:[%s3264_s7 + $0x14b0] sm:$0xff] }
 0x154   : > { %2030 = vmatpush.msra.mxu0 %v3032_v46  ;;  %1813 = vmatmul.f32.vlgmr.msra.gmra.mxu1 %v3862_v40  ;;  %v1055_v40 = vadd.f32 %v1054_v48, %v3981_v26  ;;  %v3008_v26 = vld [vmem:[%s3264_s7 + $0x13b0] sm:$0xff]  ;;  %v2999_v46 = vld [vmem:[%s3264_s7 + $0x1368] sm:$0xff]  ;;  %v3021_v48 = vld [vmem:[%s3264_s7 + $0x1418] sm:$0xff] }
 0x155   : > { %2059 = vmatpush.msrb.mxu1 %v3053_v49  ;;  %2020 = vmatpush.msrb.mxu2 %v2954_v43  ;;  %v2996_v49 = vld [vmem:[%s3264_s7 + $0x1350] sm:$0xff]  ;;  %v3018_v43 = vld [vmem:[%s3264_s7 + $0x1400] sm:$0xff] }
 0x156   : > { %2031 = vmatpush.msra.mxu0 %v3029_v45  ;;  %2068 = vmatpush.msrb.mxu3 %v2991_v52  ;;  %v1075_v12 = vadd.f32 %v3976_v23, %v1055_v40  ;;  %v3037_v45 = vld [vmem:[%s3264_s7 + $0x1498] sm:$0xff]  ;;  %v4066_v52 = vld.sshfl [vmem:[#allocation1 + $0x8] sm:$0xff pattern:$0x73625140]  ;;  %v3012_v40 = vld [vmem:[%s3264_s7 + $0x13d0] sm:$0xff] }
 0x157   : > { %2060 = vmatpush.msrb.mxu1 %v3050_v54  ;;  %2947 = vmatmul.msk.f32.vlgmr.msrb.gmra.mxu0 %vm337_vm1, %v3864_v42  ;;  %v2982_v42 = vld [vmem:[%s3264_s7 + $0x12e0] sm:$0xff]  ;;  %v2995_v54 = vld [vmem:[%s3264_s7 + $0x1348] sm:$0xff] }
 0x158   : > { %2032 = vmatpush.msra.mxu0 %v3026_v0  ;;  %2021 = vmatpush.msrb.mxu2 %v2951_v55  ;;  %v1202_v24 = vsel %vm535_vm2, %v1075_v12, %v1200_v13  ;;  %v1204_v18 = vsel %vm539_vm3, %v1075_v12, %v1200_v13  ;;  %v3034_v0 = vld [vmem:[%s3264_s7 + $0x1480] sm:$0xff]  ;;  %v3015_v55 = vld [vmem:[%s3264_s7 + $0x13e8] sm:$0xff]  ;;  %v3000_v12 = vld [vmem:[%s3264_s7 + $0x1370] sm:$0xff] }
 0x159   : > { %2061 = vmatpush.msrb.mxu1 %v3047_v8  ;;  %v1154_v1 = vpop.f32.mrf.mxu3  ;;  %2069 = vmatpush.msrb.mxu3 %v2988_v57  ;;  %v2955_v8 = vld [vmem:[%s3264_s7 + $0x1208] sm:$0xff]  ;;  %v2992_v57 = vld [vmem:[%s3264_s7 + $0x1330] sm:$0xff]  ;;  %v2977_v13 = vld [vmem:[%s3264_s7 + $0x12b8] sm:$0xff] }
 0x15a   : > { %2033 = vmatpush.msra.mxu0 %v3023_v56  ;;  %2022 = vmatpush.msrb.mxu2 %v2948_v58  ;;  %v1174_v10 = vpop.f32.mrf.mxu1  ;;  %v4074_v56 = vld.sshfl [vmem:[#allocation1 + $0x10] sm:$0xff pattern:$0x73625140]  ;;  %v3031_v58 = vld [vmem:[%s3264_s7 + $0x1468] sm:$0xff] }
 0x15b   : > { %2062 = vmatpush.msrb.mxu1 %v3044_v60  ;;  %v1175_v11 = vadd.f32 %v1174_v10, %v1154_v1  ;;  %v1194_v28 = vpop.f32.mrf.mxu2  ;;  %2070 = vmatpush.msrb.mxu3 %v2985_v62  ;;  %v2952_v60 = vld [vmem:[%s3264_s7 + $0x11f0] sm:$0xff]  ;;  %v3009_v62 = vld [vmem:[%s3264_s7 + $0x13b8] sm:$0xff]  ;;  %v2983_v10 = vld [vmem:[%s3264_s7 + $0x12e8] sm:$0xff] }
 0x15c   : > { %2034 = vmatpush.msra.mxu0 %v3020_v61  ;;  %3064 = vmatpush.msk.msra.mxu2 %vm340_vm0, %v3060_v9  ;;  %v3028_v61 = vld [vmem:[%s3264_s7 + $0x1450] sm:$0xff]  ;;  %v2949_v1 = vld [vmem:[%s3264_s7 + $0x11d8] sm:$0xff] }
 0x15d   : > { %2087 = vmatpush.msra.mxu1 %v3042_v63  ;;  %v1195_v29 = vadd.f32 %v1194_v28, %v1175_v11  ;;  %2071 = vmatpush.msrb.mxu3 %v2982_v42  ;;  %v2986_v63 = vld [vmem:[%s3264_s7 + $0x1300] sm:$0xff]  ;;  %v3025_v9 = vld [vmem:[%s3264_s7 + $0x1438] sm:$0xff]  ;;  %v2980_v11 = vld [vmem:[%s3264_s7 + $0x12d0] sm:$0xff] }
 0x15e   : > { %2035 = vmatpush.msra.mxu0 %v3017_v19  ;;  %2118 = vmatpush.msra.mxu2 %v3057_v20  ;;  %v3006_v19 = vld [vmem:[%s3264_s7 + $0x13a0] sm:$0xff]  ;;  %v3019_v28 = vld [vmem:[%s3264_s7 + $0x1408] sm:$0xff]  ;;  %v3061_v20 = vld [vmem:[%s3264_s7 + $0x1558] sm:$0xf] }
 0x15f   : > { %2088 = vmatpush.msra.mxu1 %v3039_v3  ;;  %v1201_v23 = vrot.slane %v1195_v29, 6  ;;  %2072 = vmatpush.msrb.mxu3 %v2979_v15  ;;  %v3022_v42 = vld [vmem:[%s3264_s7 + $0x1420] sm:$0xff]  ;;  %v3003_v3 = vld [vmem:[%s3264_s7 + $0x1388] sm:$0xff]  ;;  %v2997_v15 = vld [vmem:[%s3264_s7 + $0x1358] sm:$0xff] }
 0x160   : > { %2036 = vmatpush.msra.mxu0 %v3014_v14  ;;  %2119 = vmatpush.msra.mxu2 %v3054_v17  ;;  %v3016_v14 = vld [vmem:[%s3264_s7 + $0x13f0] sm:$0xff]  ;;  %v3013_v29 = vld [vmem:[%s3264_s7 + $0x13d8] sm:$0xff]  ;;  %v3058_v17 = vld [vmem:[%s3264_s7 + $0x1540] sm:$0xff] }
 0x161   : > { %2089 = vmatpush.msra.mxu1 %v3036_v16  ;;  %v1203_v32 = vsel %vm537_vm4, %v1202_v24, %v1201_v23  ;;  %v1205_v2 = vsel %vm541_vm5, %v1204_v18, %v1201_v23  ;;  %2073 = vmatpush.msrb.mxu3 %v2976_v6  ;;  %v2974_v16 = vld [vmem:[%s3264_s7 + $0x12a0] sm:$0xff]  ;;  %v2968_v23 = vld [vmem:[%s3264_s7 + $0x1270] sm:$0xff]  ;;  %v3007_v24 = vld [vmem:[%s3264_s7 + $0x13a8] sm:$0xff] }
 0x162   : > { %2037 = vmatpush.msra.mxu0 %v3011_v21  ;;  %v1206_v5 = vrot.slane %v1205_v2, 1  ;;  %1210 = vst.msk [vmem:[#allocation2 + $0x2] ss:$8 sm:$0x7] %vm3738_vm6, %v1203_v32  ;;  %2120 = vmatpush.msra.mxu2 %v3051_v25  ;;  %v2971_v21 = vld [vmem:[%s3264_s7 + $0x1288] sm:$0xff]  ;;  %v3010_v6 = vld [vmem:[%s3264_s7 + $0x13c0] sm:$0xff] }
 0x163   : > { %2090 = vmatpush.msra.mxu1 %v3033_v22  ;;  %2074 = vmatpush.msrb.mxu3 %v2973_v27  ;;  %v3055_v22 = vld [vmem:[%s3264_s7 + $0x1528] sm:$0xff]  ;;  %v3052_v18 = vld [vmem:[%s3264_s7 + $0x1510] sm:$0xff]  ;;  %v2965_v25 = vld [vmem:[%s3264_s7 + $0x1258] sm:$0xff] }
 0x164   : > { %2038 = vmatpush.msra.mxu0 %v3008_v26  ;;  %1213 = vst.msk [vmem:[#allocation2 + $0x1a] ss:$8 sm:$0x7] %vm3738_vm6, %v1206_v5  ;;  %2121 = vmatpush.msra.mxu2 %v3048_v30  ;;  %v3004_v26 = vld [vmem:[%s3264_s7 + $0x1390] sm:$0xff]  ;;  %v3049_v27 = vld [vmem:[%s3264_s7 + $0x14f8] sm:$0xff]  ;;  %v2962_v32 = vld [vmem:[%s3264_s7 + $0x1240] sm:$0xff] }
 0x165   : > { %2091 = vmatpush.msra.mxu1 %v3030_v31  ;;  %2075 = vmatpush.msrb.mxu3 %v2970_v34  ;;  %v3001_v2 = vld [vmem:[%s3264_s7 + $0x1378] sm:$0xff]  ;;  %v3046_v30 = vld [vmem:[%s3264_s7 + $0x14e0] sm:$0xff] }
 0x166   : > { %2039 = vmatpush.msra.mxu0 %v3005_v33  ;;  %2122 = vmatpush.msra.mxu2 %v3045_v36  ;;  %v2959_v33 = vld [vmem:[%s3264_s7 + $0x1228] sm:$0xff]  ;;  %v2998_v34 = vld [vmem:[%s3264_s7 + $0x1360] sm:$0xff]  ;;  %v2953_v36 = vld [vmem:[%s3264_s7 + $0x11f8] sm:$0xff] }
 0x167   : > { %2092 = vmatpush.msra.mxu1 %v3027_v35  ;;  %2023 = vmatmul.f32.vlgmr.msrb.gmra.mxu2 %v4052_v4  ;;  %v2956_v35 = vld [vmem:[%s3264_s7 + $0x1210] sm:$0xff] }
 0x168   : > { %2040 = vmatpush.msra.mxu0 %v3002_v38  ;;  %2076 = vmatpush.msrb.mxu3 %v2967_v39  ;;  %v2950_v38 = vld [vmem:[%s3264_s7 + $0x11e0] sm:$0xff]  ;;  %s202_s7 = sand.u32 1, %s3171_s16  }
 0x169   : > { %2147 = vmatpush.msrb.mxu2 %v3043_v41  ;;  %2093 = vmatpush.msra.mxu1 %v3024_v44  ;;  %s2460_s8 = sshll.u32 %s202_s7, 1  ;;  %s2373_s19 = scalar_lea.sflag [#allocation4], %s202_s7 }
 0x16a   : > { %2041 = vmatpush.msra.mxu0 %v2999_v46  ;;  %2077 = vmatpush.msrb.mxu3 %v2964_v7  ;;  %s204_s13 = scalar_lea.vmem [#allocation3], %s2460_s8 }
 0x16b   : > { %2148 = vmatpush.msrb.mxu2 %v3040_v47  ;;  %2094 = vmatpush.msra.mxu1 %v3021_v48  ;;  %s2385_s14 = sshll.u32 %s204_s13, 4  ;;  %s2386_s14 = int_to_ptr.vmem [resolvable:$true] %s2385_s14 }
 0x16c   : > { %2042 = vmatpush.msra.mxu0 %v2996_v49  ;;  %2078 = vmatpush.msrb.mxu3 %v2961_v50 }
 0x16d   : > { %2149 = vmatpush.msrb.mxu2 %v3037_v45  ;;  %2095 = vmatpush.msra.mxu1 %v3018_v43 }
 0x16e   : > { %2043 = vmatmul.f32.vlgmr.msra.gmra.mxu0 %v4066_v52  ;;  %2079 = vmatpush.msrb.mxu3 %v2958_v53 }
 0x16f   : > { %2127 = vmatpush.msrb.mxu0 %v2995_v54  ;;  %2150 = vmatpush.msrb.mxu2 %v3034_v0 }
 0x170   : > { %2096 = vmatpush.msra.mxu1 %v3015_v55  ;;  %2080 = vmatpush.msrb.mxu3 %v2955_v8 }
 0x171   : > { %3063 = vmatmul.msk.f32.vlgmr.msrb.gmra.mxu1 %vm337_vm1, %v4074_v56  ;;  %2128 = vmatpush.msrb.mxu0 %v2992_v57  ;;  %v1364_v5 = vpop.f32.mrf.mxu0 }
 0x172   : > { %2151 = vmatpush.msrb.mxu2 %v3031_v58  ;;  %2097 = vmatpush.msra.mxu1 %v3012_v40 }
 0x173   : > { %2129 = vmatpush.msrb.mxu0 %v2989_v59  ;;  %2081 = vmatpush.msrb.mxu3 %v2952_v60 }
 0x174   : > { %2152 = vmatpush.msrb.mxu2 %v3028_v61  ;;  %2098 = vmatpush.msra.mxu1 %v3009_v62 }
 0x175   : > { %2130 = vmatpush.msrb.mxu0 %v2986_v63  ;;  %2082 = vmatpush.msrb.mxu3 %v2949_v1 }
 0x176   : > { %2153 = vmatpush.msrb.mxu2 %v3025_v9  ;;  %2099 = vmatpush.msra.mxu1 %v3006_v19 }
 0x177   : > { %2083 = vmatmul.f32.vlgmr.msrb.gmra.mxu3 %v4052_v4  ;;  %2131 = vmatpush.msrb.mxu0 %v2983_v10 }
 0x178   : > { %2154 = vmatpush.msrb.mxu2 %v3022_v42  ;;  %2100 = vmatpush.msra.mxu1 %v3003_v3  ;;  %v1384_v39 = vpop.f32.mrf.mxu2 }
 0x179   : > { %3065 = vmatmul.msk.f32.vlgmr.msra.gmra.mxu2 %vm337_vm1, %v4074_v56  ;;  %2132 = vmatpush.msrb.mxu0 %v2980_v11  ;;  %v1385_v50 = vadd.f32 %v1384_v39, %v1364_v5 }
 0x17a   : > { %2155 = vmatpush.msrb.mxu2 %v3019_v28  ;;  %2101 = vmatpush.msra.mxu1 %v3000_v12  ;;  %v1404_v31 = vpop.f32.mrf.mxu3 }
 0x17b   : > { %2133 = vmatpush.msrb.mxu0 %v2977_v13  ;;  %3066 = vmatpush.msk.msra.mxu3 %vm340_vm0, %v3061_v20 }
 0x17c   : > { %2156 = vmatpush.msrb.mxu2 %v3016_v14  ;;  %2102 = vmatpush.msra.mxu1 %v2997_v15 }
 0x17d   : > { %2103 = vmatmul.f32.vlgmr.msra.gmra.mxu1 %v4066_v52  ;;  %2134 = vmatpush.msrb.mxu0 %v2974_v16 }
 0x17e   : > { %2157 = vmatpush.msrb.mxu2 %v3013_v29  ;;  %2178 = vmatpush.msra.mxu3 %v3058_v17 }
 0x17f   : > { %2135 = vmatpush.msrb.mxu0 %v2971_v21 }
 0x180   : > { %2158 = vmatpush.msrb.mxu2 %v3010_v6  ;;  %2179 = vmatpush.msra.mxu3 %v3055_v22 }
 0x181   : > { %2136 = vmatpush.msrb.mxu0 %v2968_v23 }
 0x182   : > { %2159 = vmatpush.msrb.mxu2 %v3007_v24  ;;  %2180 = vmatpush.msra.mxu3 %v3052_v18  ;;  %v1444_v41 = vpop.f32.mrf.mxu3 }
 0x183   : > { %2137 = vmatpush.msrb.mxu0 %v2965_v25  ;;  %v1424_v44 = vpop.f32.mrf.mxu1 }
 0x184   : > { %2160 = vmatpush.msrb.mxu2 %v3004_v26  ;;  %2181 = vmatpush.msra.mxu3 %v3049_v27  ;;  %v1445_v7 = vadd.f32 %v1444_v41, %v1424_v44 }
 0x185   : > { %2138 = vmatpush.msrb.mxu0 %v2962_v32 }
 0x186   : > { %2161 = vmatpush.msrb.mxu2 %v3001_v2  ;;  %2182 = vmatpush.msra.mxu3 %v3046_v30  ;;  %v1464_v46 = vpop.f32.mrf.mxu0 }
 0x187   : > { %2139 = vmatpush.msrb.mxu0 %v2959_v33  ;;  %3067 = vmatmul.msk.f32.vlgmr.msra.gmra.mxu3 %vm337_vm1, %v4074_v56  ;;  %v1465_v47 = vadd.f32 %v1464_v46, %v1445_v7 }
 0x188   : > { %2162 = vmatpush.msrb.mxu2 %v2998_v34 }
 0x189   : > { %2163 = vmatmul.f32.vlgmr.msrb.gmra.mxu2 %v4066_v52  ;;  %2140 = vmatpush.msrb.mxu0 %v2956_v35  ;;  %v1530_v43 = vrot.slane %v1465_v47, 7  ;;  %v1405_v52 = vadd.f32 %v1404_v31, %v1385_v50  ;;  %v2211_v47 = vld [vmem:[%s4214_s1] sm:$0x1f] }
 0x18b   : > { %2141 = vmatpush.msrb.mxu0 %v2953_v36  ;;  %v1532_v55 = vsel %vm535_vm2, %v1405_v52, %v1530_v43  ;;  %v1534_v8 = vsel %vm539_vm3, %v1405_v52, %v1530_v43  ;;  %v2216_v43 = vld [vmem:[%s4214_s1 + $0x28] sm:$0x1f] }
 0x18d   : > { %2142 = vmatpush.msrb.mxu0 %v2950_v38 }
 0x18e   : > { %2143 = vmatmul.f32.vlgmr.msrb.gmra.mxu0 %v4052_v4 }
 0x195   : > { %v1484_v48 = vpop.f32.mrf.mxu2  ;;  %v1504_v49 = vpop.f32.mrf.mxu0 }
 0x196   : > { %v1505_v45 = vadd.f32 %v1504_v49, %v1484_v48  ;;  %v2212_v48 = vld [vmem:[%s4214_s1 + $0x8] sm:$0x1f] }
 0x198   : > { %v1524_v53 = vpop.f32.mrf.mxu1 }
 0x199   : > { %v1525_v54 = vadd.f32 %v1524_v53, %v1505_v45  ;;  %v2215_v45 = vld [vmem:[%s4214_s1 + $0x20] sm:$0x1f]  ;;  %v2213_v53 = vld [vmem:[%s4214_s1 + $0x10] sm:$0x1f] }
 0x19b   : > { %v1531_v0 = vrot.slane %v1525_v54, 6  ;;  %v2214_v54 = vld [vmem:[%s4214_s1 + $0x18] sm:$0x1f] }
 0x19d   : > { %v1533_v56 = vsel %vm537_vm4, %v1532_v55, %v1531_v0  ;;  %v1535_v57 = vsel %vm541_vm5, %v1534_v8, %v1531_v0 }
 0x19e   : > { %v1536_v4 = vrot.slane %v1535_v57, 1  ;;  %1540 = vst.msk [vmem:[#allocation2 + $0x3] ss:$8 sm:$0x7] %vm3738_vm6, %v1533_v56  ;;  %v3116_v56 = vld [vmem:[%s214_s6] ss:$0 sm:$0xff] }
 0x1a0   : > { %1543 = vst.msk [vmem:[#allocation2 + $0x1b] ss:$8 sm:$0x7] %vm3738_vm6, %v1536_v4 }
 0x1b1   : > { %v1694_v40 = vpop.f32.mrf.mxu3 }
 0x1b3   : > { %v1734_v58 = vpop.f32.mrf.mxu2 }
 0x1bb   : > { %v1714_v59 = vpop.f32.mrf.mxu1 }
 0x1bc   : > { %v1715_v19 = vadd.f32 %v1714_v59, %v1694_v40 }
 0x1bd   : > { %v1774_v61 = vpop.f32.mrf.mxu2 }
 0x1be   : > { %v1754_v60 = vpop.f32.mrf.mxu0  ;;  %v1735_v12 = vadd.f32 %v1734_v58, %v1715_v19  ;;  %v2365_v19 = vand.u32 127, %v546_v37 }
 0x1bf   : > { %v1794_v62 = vpop.f32.mrf.mxu3  ;;  %v1775_v63 = vadd.f32 %v1774_v61, %v1754_v60 }
 0x1c1   : > { %v1795_v1 = vadd.f32 %v1794_v62, %v1775_v63 }
 0x1c3   : > { %v1860_v3 = vrot.slane %v1795_v1, 7 }
 0x1c5   : > { %v1862_v20 = vsel %vm535_vm2, %v1735_v12, %v1860_v3  ;;  %v1864_v14 = vsel %vm539_vm3, %v1735_v12, %v1860_v3 }
 0x1d1   : > { %v1814_v9 = vpop.f32.mrf.mxu1 }
 0x1d3   : > { %v1834_v10 = vpop.f32.mrf.mxu3 }
 0x1d4   : > { %v1835_v42 = vadd.f32 %v1834_v10, %v1814_v9  ;;  %v1854_v11 = vpop.f32.mrf.mxu0 }
 0x1d6   : > { %v1855_v28 = vadd.f32 %v1854_v11, %v1835_v42 }
 0x1d8   : > { %v1861_v13 = vrot.slane %v1855_v28, 6 }
 0x1da   : > { %v1863_v15 = vsel %vm537_vm4, %v1862_v20, %v1861_v13  ;;  %v1865_v16 = vsel %vm541_vm5, %v1864_v14, %v1861_v13 }
 0x1db   : > { %v1866_v29 = vrot.slane %v1865_v16, 1  ;;  %1870 = vst.msk [vmem:[#allocation2 + $0x4] ss:$8 sm:$0x7] %vm3738_vm6, %v1863_v15 }
 0x1dd   : > { %1873 = vst.msk [vmem:[#allocation2 + $0x1c] ss:$8 sm:$0x7] %vm3738_vm6, %v1866_v29 }
 0x1ea   : > { %v2024_v21 = vpop.f32.mrf.mxu2 }
 0x1eb   : > { %v2044_v6 = vpop.f32.mrf.mxu0 }
 0x1ec   : > { %v2045_v27 = vadd.f32 %v2044_v6, %v2024_v21 }
 0x1ee   : > { %v2064_v17 = vpop.f32.mrf.mxu1 }
 0x1ef   : > { %v2065_v5 = vadd.f32 %v2064_v17, %v2045_v27 }
 0x1fa   : > { %v2084_v22 = vpop.f32.mrf.mxu3  ;;  %v2104_v23 = vpop.f32.mrf.mxu1 }
 0x1fb   : > { %v2105_v18 = vadd.f32 %v2104_v23, %v2084_v22 }
 0x1fc   : > { %v2124_v24 = vpop.f32.mrf.mxu2 }
 0x1fd   : > { %v2125_v25 = vadd.f32 %v2124_v24, %v2105_v18 }
 0x1ff   : > { %v2190_v30 = vrot.slane %v2125_v25, 7 }
 0x201   : > { %v2192_v35 = vsel %vm535_vm2, %v2065_v5, %v2190_v30  ;;  %v2194_v36 = vsel %vm539_vm3, %v2065_v5, %v2190_v30 }
 0x20a   : > { %v2184_v32 = vpop.f32.mrf.mxu3 }
 0x20b   : > { %v2144_v26 = vpop.f32.mrf.mxu0 }
 0x20c   : > { %v2164_v31 = vpop.f32.mrf.mxu2 }
 0x20d   : > { %v2165_v2 = vadd.f32 %v2164_v31, %v2144_v26 }
 0x20f   : > { %v2185_v33 = vadd.f32 %v2184_v32, %v2165_v2 }
 0x211   : > { %v2191_v34 = vrot.slane %v2185_v33, 6 }
 0x213   : > { %v2193_v38 = vsel %vm537_vm4, %v2192_v35, %v2191_v34  ;;  %v2195_v39 = vsel %vm541_vm5, %v2194_v36, %v2191_v34 }
 0x214   : > { %v2196_v41 = vrot.slane %v2195_v39, 1  ;;  %2200 = vst.msk [vmem:[#allocation2 + $0x5] ss:$8 sm:$0x7] %vm3738_vm6, %v2193_v38 }
 0x216   : > { %2203 = vst.msk [vmem:[#allocation2 + $0x1d] ss:$8 sm:$0x7] %vm3738_vm6, %v2196_v41 }
 0x21b   : > { %v2205_v44 = vld [vmem:[#allocation2] sm:$0x3f]  ;;  %v2206_v46 = vld [vmem:[#allocation2 + $0x8] sm:$0x3f]  ;;  %v2207_v7 = vld [vmem:[#allocation2 + $0x10] sm:$0x3f] }
 0x21c   : > { %2238 = vmatpush.xpose.msrb.mxu1 %v2205_v44  ;;  %2258 = vmatpush.xpose.msrb.mxu3 %v2206_v46 }
 0x21d   : > { %v2208_v49 = vld [vmem:[#allocation2 + $0x18] sm:$0x3f]  ;;  %v2209_v51 = vld [vmem:[#allocation2 + $0x20] sm:$0x3f]  ;;  %v2210_v50 = vld [vmem:[#allocation2 + $0x28] sm:$0x3f] }
 0x21e   : > { %2324 = vmatpush.xpose.msra.mxu0 %v2209_v51  ;;  %3070 = vmatpush.xpose.msk.msra.mxu2 %vm337_vm1, %v2210_v50 }
 0x21f   : > { %2239 = vmatmul.f32.vlgmr.msrb.gmra.mxu1 %v2211_v47  ;;  %2259 = vmatmul.f32.vlgmr.msrb.gmra.mxu3 %v2212_v48 }
 0x220   : > { %3068 = vmatpush.xpose.msk.msra.mxu1 %vm337_vm1, %v2207_v7  ;;  %2304 = vmatpush.xpose.msra.mxu3 %v2208_v49 }
 0x221   : > { %2325 = vmatmul.f32.vlgmr.msra.gmra.mxu0 %v2215_v45  ;;  %3071 = vmatmul.msk.f32.vlgmr.msra.gmra.mxu2 %vm337_vm1, %v2216_v43 }
 0x227   : > { %3069 = vmatmul.msk.f32.vlgmr.msra.gmra.mxu1 %vm337_vm1, %v2213_v53  ;;  %2305 = vmatmul.f32.vlgmr.msra.gmra.mxu3 %v2214_v54 }
 0x29c   : > { %v2240_v52 = vpop.f32.mrf.mxu1 }
 0x29e   : > { %v2326_v58 = vpop.f32.mrf.mxu0 }
 0x2a2   : > { %v2260_v0 = vpop.f32.mrf.mxu3 }
 0x2a3   : > { %v2261_v55 = vadd.f32 %v2260_v0, %v2240_v52 }
 0x2a4   : > { %v2280_v8 = vpop.f32.mrf.mxu1  ;;  %v2346_v60 = vpop.f32.mrf.mxu2 }
 0x2a5   : > { %v2281_v57 = vadd.f32 %v2280_v8, %v2261_v55 }
 0x2a7   : > { %v2353_v4 = vmul.f32 %v3116_v56, %v2281_v57 }
 0x2a9   : > { %v2356_v40 = vsel %vm2355_vm7, %v2353_v4, 0.0 }
 0x2aa   : > { %v2306_v59 = vpop.f32.mrf.mxu3  ;;  %2357 = vadd.xlane.f32.xlu0 %v2356_v40 }
 0x2ab   : > { %v2327_v61 = vadd.f32 %v2326_v58, %v2306_v59 }
 0x2ad   : > { %v2347_v62 = vadd.f32 %v2346_v60, %v2327_v61 }
 0x2af   : > { %v2354_v63 = vmul.f32 %v3116_v56, %v2347_v62 }
 0x2b1   : > { %v2359_v1 = vsel %vm2355_vm7, %v2354_v63, 0.0 }
 0x2b2   : > { %2360 = vadd.xlane.f32.xlu0 %v2359_v1 }
 0x31d   : > { %v2358_v9 = vpop.xlane.xlu0 %2357 }
 0x31e   : > { %v2366_v42 = vperm.slane %v2358_v9, %v2365_v19 }
 0x325   : > { %v2361_v10 = vpop.xlane.xlu0 %2360 }
 0x326   : > { %v2367_v3 = vperm.slane %v2361_v10, %v2365_v19 }
 0x328   : > { %v2368_v11 = vsel %vm539_vm3, %v2367_v3, %v2366_v42 }
 0x329   : > { %2371 = vst.msk [vmem:[%s204_s13] sm:$0x3] %vm2370_vm8, %v2368_v11 }
 0x32a   : > { %3144 = shalt.err (!%p3141_p4)
}
 0x32b   : > { %3077 = dma.vmem_to_hbm [thread:$0]  (%p3244_p5), %s2386_s14, 32, %s2388_s20, %s2373_s19  }
 0x32c PF: > { %p3083_p7 = scmp.ge.s32.totalorder %s3179_s18, 2  ;;  %s2399_s6 = sand.u32 1, %s3167_s15  }
 0x32d   : > { %s2400_s7 = scalar_lea.sflag [#allocation4], %s2399_s6 }
 0x32e   : > { %p3080_p8 = pnand %p3083_p7, %p3248_p6 }
 0x330   : > { %p3081_p9 = pneg %p3080_p8 }
 0x332   : > { %3162 = dma.done.wait (%p3081_p9), %s2400_s7, 32  }
 0x333   : > { %3164 = vsyncadd (%p3081_p9), %s2400_s7, 4294967264  ;;  %p14_p10 = scmp.ge.s32.totalorder %s3231_s21, 6   ;;  %s4222_s15 = smov %s3171_s16 }
 0x334   : > { %s4223_s16 = smov %s3175_s17  ;;  %s4224_s17 = smov %s3242_s24 }
 0x335   : > { %s4225_s18 = smov %s3231_s21  ;;  %16 = sbr.rel (!%p14_p10) target bundleno = 3 (0x3), region = 90 }
 0x33a   :  { %2406 = vsyncpa [#allocation4], 1 }
 0x33b   :  { %2408 = vsyncpa [#allocation4 + $0x1], 1 }

</bundles_post_ra>
